<compile_context>
chip_gen: v7x
topology: tpu7x:2x2x1
jax: 0.10.0
libtpu: 0.0.40
codegen_flags: <defaults>
</compile_context>

<pallas_src>
import jax
import jax.numpy as jnp
import numpy as np
from jax.experimental import pallas as pl
from jax.experimental.pallas import tpu as pltpu


# ---------------------------------------------------------------------------
# Kernel. Grid = (M tiles, K tiles of fc2). The fc2 pre-activation is
# accumulated in an fp32 VMEM scratch across the K axis; fc1/fc3/fc4 run once
# per M tile on the final K step.
# ---------------------------------------------------------------------------
def quant_mlp_kernel(x1_ref, x2_ref,
                     w1_ref, b1_ref,
                     w2_ref, b2_ref,
                     w3a_ref, w3b_ref, b3_ref,
                     w4_ref, b4_ref,
                     out_ref, acc_ref):
    k = pl.program_id(1)

    @pl.when(k == 0)
    def _init():
        acc_ref[...] = jnp.zeros_like(acc_ref)

    # fc2 partial sum for this K tile. x2 arrives f32 from HBM and is cast to
    # bf16 here (free VPU work in a memory-bound kernel); fp32 accumulation.
    acc_ref[...] += jnp.dot(x2_ref[...].astype(jnp.bfloat16), w2_ref[...],
                            preferred_element_type=jnp.float32)

    @pl.when(k == pl.num_programs(1) - 1)
    def _finalize():
        # branch 1: relu(fc1(x1))
        h1 = jnp.maximum(
            jnp.dot(x1_ref[...].astype(jnp.bfloat16), w1_ref[...],
                    preferred_element_type=jnp.float32) + b1_ref[...], 0.0)
        # branch 2: relu(fc2(flatten(x2)))  (accumulated over K tiles)
        h2 = jnp.maximum(acc_ref[...] + b2_ref[...], 0.0)
        # relu(fc3(concat([h1, h2]))) == relu(h1 @ W3a + h2 @ W3b + b3)
        h3 = jnp.maximum(
            jnp.dot(h1.astype(jnp.bfloat16), w3a_ref[...],
                    preferred_element_type=jnp.float32)
            + jnp.dot(h2.astype(jnp.bfloat16), w3b_ref[...],
                      preferred_element_type=jnp.float32)
            + b3_ref[...], 0.0)
        # fc4 (no activation)
        out_ref[...] = (
            jnp.dot(h3.astype(jnp.bfloat16), w4_ref[...],
                    preferred_element_type=jnp.float32) + b4_ref[...]
        ).astype(out_ref.dtype)


# ---------------------------------------------------------------------------
# One-time parameter preparation (OUTSIDE the per-call forward).
# ---------------------------------------------------------------------------
def prepare_params(params):
    """Convert fp32 (in, out)-layout params into kernel-ready bf16 weights.

    Done once at init: the f32->bf16 cast of W2 alone would otherwise add
    ~225 MiB of HBM traffic to every forward call.
    """
    w1, b1, w2, b2, w3, b3, w4, b4 = params
    H1, H2 = w1.shape[1], w2.shape[1]
    assert w3.shape[0] == H1 + H2, "fc3 input must be concat(fc1, fc2) widths"

    # One-time 128-alignment pad of W2's K dim (no-op when K % 128 == 0,
    # which holds for both the toy 768 and the real 76800 feature counts).
    K = w2.shape[0]
    K_pad = pl.cdiv(K, 128) * 128
    w2p = w2 if K_pad == K else jnp.pad(w2, ((0, K_pad - K), (0, 0)))

    bf = lambda a: jnp.asarray(a, jnp.bfloat16)
    row = lambda b: jnp.asarray(b, jnp.float32).reshape(1, -1)
    return dict(
        w1=bf(w1), b1=row(b1),
        w2=bf(w2p), b2=row(b2),
        w3a=bf(w3[:H1]), w3b=bf(w3[H1:]), b3=row(b3),
        w4=bf(w4), b4=row(b4),
    )


# ---------------------------------------------------------------------------
# Forward wrapper.
# ---------------------------------------------------------------------------
def quant_model_forward(x1, x2, prepared, *, tk_max=6400,
                        vmem_limit_bytes=48 * 1024 * 1024):
    """x1: (B, in_tab) f32, x2: (B, C, H, W) f32 -> (B, out_quantiles) f32."""
    w1, b1 = prepared["w1"], prepared["b1"]
    w2, b2 = prepared["w2"], prepared["b2"]
    w3a, w3b, b3 = prepared["w3a"], prepared["w3b"], prepared["b3"]
    w4, b4 = prepared["w4"], prepared["b4"]

    B = x1.shape[0]
    IN_TAB = w1.shape[0]
    H1, H2, H3 = w1.shape[1], w2.shape[1], w3a.shape[1]
    OQ = w4.shape[1]
    K_pad = w2.shape[0]                       # 128-aligned at prep time
    K = int(np.prod(x2.shape[1:]))            # logical in_ctscan_features

    # glue: the .view(-1, in_ctscan_features) from the torch module
    x1 = x1.astype(jnp.float32)
    x2_flat = x2.reshape(-1, K).astype(jnp.float32)
    assert x2_flat.shape[0] == B
    if K_pad != K:                            # only triggers when K % 128 != 0
        x2_flat = jnp.pad(x2_flat, ((0, 0), (0, K_pad - K)))

    # --- M (batch) tiling: fixed, sublane-aligned tm; pad B, slice output ---
    if B >= 512:
        tm = 512
    elif B >= 256:
        tm = 256
    else:
        tm = max(8, pl.cdiv(B, 8) * 8)
    B_pad = pl.cdiv(B, tm) * tm
    if B_pad != B:
        x1 = jnp.pad(x1, ((0, B_pad - B), (0, 0)))
        x2_flat = jnp.pad(x2_flat, ((0, B_pad - B), (0, 0)))

    # --- fc2 K tile: largest multiple-of-128 exact divisor of K_pad that is
    #     <= tk_max and whose double-buffered (f32 x2 tile + bf16 W2 tile)
    #     footprint fits the VMEM budget. 76800 -> 6400 (12 steps). ----------
    resident_bytes = 2 * ((w1.size + w3a.size + w3b.size + w4.size) * 2
                          + (H1 + H2 + H3 + OQ) * 4)
    acc_bytes = tm * H2 * 4
    budget = vmem_limit_bytes - resident_bytes - acc_bytes - (4 << 20)

    def _fits(tk):
        return 2 * (tm * tk * 4 + tk * H2 * 2) <= budget

    tk = 128
    cand = 128
    while cand <= min(K_pad, tk_max):
        if K_pad % cand == 0 and _fits(cand):
            tk = cand
        cand += 128

    grid = (B_pad // tm, K_pad // tk)

    grid_spec = pltpu.PrefetchScalarGridSpec(
        num_scalar_prefetch=0,
        grid=grid,
        in_specs=[
            pl.BlockSpec((tm, IN_TAB), lambda m, k: (m, 0)),   # x1 (f32)
            pl.BlockSpec((tm, tk),     lambda m, k: (m, k)),   # x2 (f32, K-tiled)
            pl.BlockSpec((IN_TAB, H1), lambda m, k: (0, 0)),   # W1 (resident)
            pl.BlockSpec((1, H1),      lambda m, k: (0, 0)),   # b1
            pl.BlockSpec((tk, H2),     lambda m, k: (k, 0)),   # W2 (bf16 stream)
            pl.BlockSpec((1, H2),      lambda m, k: (0, 0)),   # b2
            pl.BlockSpec((H1, H3),     lambda m, k: (0, 0)),   # W3a (resident)
            pl.BlockSpec((H2, H3),     lambda m, k: (0, 0)),   # W3b (resident)
            pl.BlockSpec((1, H3),      lambda m, k: (0, 0)),   # b3
            pl.BlockSpec((H3, OQ),     lambda m, k: (0, 0)),   # W4 (resident)
            pl.BlockSpec((1, OQ),      lambda m, k: (0, 0)),   # b4
        ],
        out_specs=pl.BlockSpec((tm, OQ), lambda m, k: (m, 0)),
        scratch_shapes=[pltpu.VMEM((tm, H2), jnp.float32)],    # fc2 accumulator
    )

    flops = 2 * B_pad * (IN_TAB * H1 + K_pad * H2 + (H1 + H2) * H3 + H3 * OQ)
    bytes_accessed = (x1.size * 4 + x2_flat.size * 4
                      + (B_pad // tm) * w2.size * 2            # W2 per M tile
                      + (w1.size + w3a.size + w3b.size + w4.size) * 2
                      + (H1 + H2 + H3 + OQ) * 4
                      + B_pad * OQ * 4)

    out = pl.pallas_call(
        quant_mlp_kernel,
        out_shape=jax.ShapeDtypeStruct((B_pad, OQ), jnp.float32),
        grid_spec=grid_spec,
        compiler_params=pltpu.CompilerParams(
            dimension_semantics=("parallel", "arbitrary"),
            vmem_limit_bytes=vmem_limit_bytes),
        cost_estimate=pl.CostEstimate(flops=flops, transcendentals=0,
                                      bytes_accessed=bytes_accessed),
    )(x1, x2_flat, w1, b1, w2, b2, w3a, w3b, b3, w4, b4)

    return out[:B] if B_pad != B else out


# ---------------------------------------------------------------------------
# Deterministic parameter construction (PyTorch nn.Linear-style uniform init),
# stored as (in, out) so the kernel does x @ W.
# ---------------------------------------------------------------------------
def init_params(key, in_tab, in_ct, hidden1=512, hidden3=512, out_q=3):
    def linear(key, fan_in, fan_out):
        kw, kb = jax.random.split(key)
        bound = 1.0 / np.sqrt(fan_in)
        w = jax.random.uniform(kw, (fan_in, fan_out), jnp.float32, -bound, bound)
        b = jax.random.uniform(kb, (fan_out,), jnp.float32, -bound, bound)
        return w, b

    k1, k2, k3, k4 = jax.random.split(key, 4)
    w1, b1 = linear(k1, in_tab, hidden1)          # fc1: in_tab -> 512
    w2, b2 = linear(k2, in_ct, hidden1)           # fc2: in_ct  -> 512
    w3, b3 = linear(k3, 2 * hidden1, hidden3)     # fc3: 1024   -> 512
    w4, b4 = linear(k4, hidden3, out_q)           # fc4: 512    -> 3
    return (w1, b1, w2, b2, w3, b3, w4, b4)


# plain-JAX reference using the SAME bf16-weight / fp32-accumulate arithmetic
# as the kernel (only the K-tile accumulation order differs).
def reference_forward(x1, x2, params):
    w1, b1, w2, b2, w3, b3, w4, b4 = params
    bf = lambda a: a.astype(jnp.bfloat16)
    h1 = jax.nn.relu(jnp.dot(bf(x1), bf(w1),
                             preferred_element_type=jnp.float32) + b1)
    h2 = jax.nn.relu(jnp.dot(bf(x2.reshape(-1, w2.shape[0])), bf(w2),
                             preferred_element_type=jnp.float32) + b2)
    h = jnp.concatenate([h1, h2], axis=1)
    h = jax.nn.relu(jnp.dot(bf(h), bf(w3),
                            preferred_element_type=jnp.float32) + b3)
    return jnp.dot(bf(h), bf(w4), preferred_element_type=jnp.float32) + b4


if __name__ == "__main__":
    # Small shapes consistent with the module's forward:
    #   x1: tabular features (B, 9)
    #   x2: "ct scan" image  (B, 3, 16, 16) -> flattened to (B, 768)
    B = 8
    IN_TAB = 9
    C, H, W = 3, 16, 16
    IN_CT = C * H * W        # small stand-in for the 76800 default

    key = jax.random.PRNGKey(0)
    kp, kx1, kx2 = jax.random.split(key, 3)
    params = init_params(kp, IN_TAB, IN_CT)
    prepared = prepare_params(params)        # one-time bf16 / split / pad

    x1 = jax.random.normal(kx1, (B, IN_TAB), jnp.float32)
    x2 = jax.random.normal(kx2, (B, C, H, W), jnp.float32)

    # tk_max=256 so the toy 768-feature fc2 exercises the 3-step K-tiled
    # accumulator path; the real 76800-feature model uses the default
    # tk_max=6400 (12 exact K steps, no padding).
    out = jax.block_until_ready(
        quant_model_forward(x1, x2, prepared, tk_max=256))
    ref = jax.block_until_ready(reference_forward(x1, x2, params))

    assert out.shape == (B, 3)
    np.testing.assert_allclose(np.asarray(out), np.asarray(ref),
                               rtol=1e-2, atol=1e-2)
    print("KERNEL_OK")
</pallas_src>

<mosaic_0001>
module attributes {stable_mosaic.version = 11 : i64} {
  func.func @quant_mlp_kernel(%arg0: i32, %arg1: i32, %arg2: memref<8x9xf32, #tpu.memory_space<vmem>>, %arg3: memref<8x256xf32, #tpu.memory_space<vmem>>, %arg4: memref<9x512xbf16, #tpu.memory_space<vmem>>, %arg5: memref<1x512xf32, #tpu.memory_space<vmem>>, %arg6: memref<256x512xbf16, #tpu.memory_space<vmem>>, %arg7: memref<1x512xf32, #tpu.memory_space<vmem>>, %arg8: memref<512x512xbf16, #tpu.memory_space<vmem>>, %arg9: memref<512x512xbf16, #tpu.memory_space<vmem>>, %arg10: memref<1x512xf32, #tpu.memory_space<vmem>>, %arg11: memref<512x3xbf16, #tpu.memory_space<vmem>>, %arg12: memref<1x3xf32, #tpu.memory_space<vmem>>, %arg13: memref<8x3xf32, #tpu.memory_space<vmem>>, %arg14: memref<8x512xf32, #tpu.memory_space<vmem>>) attributes {dimension_semantics = [#tpu.dimension_semantics<parallel>, #tpu.dimension_semantics<arbitrary>], iteration_bounds = array<i64: 1, 3>, scalar_prefetch = 0 : i64, scratch_operands = 1 : i64, tpu.core_type = #tpu.core_type<tc>, window_params = [{transform_indices = @transform_0, window_bounds = array<i64: 8, 9>}, {transform_indices = @transform_1, window_bounds = array<i64: 8, 256>}, {pipeline_mode = #tpu.pipeline_mode<synchronous>, transform_indices = @transform_2, window_bounds = array<i64: 9, 512>}, {pipeline_mode = #tpu.pipeline_mode<synchronous>, transform_indices = @transform_3, window_bounds = array<i64: 1, 512>}, {transform_indices = @transform_4, window_bounds = array<i64: 256, 512>}, {pipeline_mode = #tpu.pipeline_mode<synchronous>, transform_indices = @transform_5, window_bounds = array<i64: 1, 512>}, {pipeline_mode = #tpu.pipeline_mode<synchronous>, transform_indices = @transform_6, window_bounds = array<i64: 512, 512>}, {pipeline_mode = #tpu.pipeline_mode<synchronous>, transform_indices = @transform_7, window_bounds = array<i64: 512, 512>}, {pipeline_mode = #tpu.pipeline_mode<synchronous>, transform_indices = @transform_8, window_bounds = array<i64: 1, 512>}, {pipeline_mode = #tpu.pipeline_mode<synchronous>, transform_indices = @transform_9, window_bounds = array<i64: 512, 3>}, {pipeline_mode = #tpu.pipeline_mode<synchronous>, transform_indices = @transform_10, window_bounds = array<i64: 1, 3>}, {transform_indices = @transform_11, window_bounds = array<i64: 8, 3>}]} {
    %c0_i32 = arith.constant 0 : i32
    %0 = arith.cmpi eq, %arg1, %c0_i32 : i32
    %1 = arith.extui %0 : i1 to i32
    %c0_i32_0 = arith.constant 0 : i32
    %2 = arith.cmpi ne, %1, %c0_i32_0 : i32
    scf.if %2 {
      %cst_9 = arith.constant 0.000000e+00 : f32
      %13 = vector.broadcast %cst_9 : f32 to vector<8x512xf32>
      %c0_10 = arith.constant 0 : index
      %c0_11 = arith.constant 0 : index
      %14 = vector.load %arg14[%c0_10, %c0_11] : memref<8x512xf32, #tpu.memory_space<vmem>>, vector<8x512xf32>
      tpu.vector_store %arg14[%c0_10, %c0_11], %13 {strides = array<i32>} : memref<8x512xf32, #tpu.memory_space<vmem>>, vector<8x512xf32>,
    } else {
    }
    %c0 = arith.constant 0 : index
    %c0_1 = arith.constant 0 : index
    %3 = vector.load %arg14[%c0, %c0_1] : memref<8x512xf32, #tpu.memory_space<vmem>>, vector<8x512xf32>
    %c0_2 = arith.constant 0 : index
    %c0_3 = arith.constant 0 : index
    %4 = vector.load %arg3[%c0_2, %c0_3] : memref<8x256xf32, #tpu.memory_space<vmem>>, vector<8x256xf32>
    %5 = arith.truncf %4 : vector<8x256xf32> to vector<8x256xbf16>
    %c0_4 = arith.constant 0 : index
    %c0_5 = arith.constant 0 : index
    %6 = vector.load %arg6[%c0_4, %c0_5] : memref<256x512xbf16, #tpu.memory_space<vmem>>, vector<256x512xbf16>
    %cst = arith.constant dense<0.000000e+00> : vector<8x512xf32>
    %7 = tpu.matmul %5, %6, %cst {dimension_numbers = #tpu.dot_dimension_numbers<[1], [0], [0], [1], [0, 0, 1, 1], [], []>} : vector<8x256xbf16>, vector<256x512xbf16>, vector<8x512xf32> -> vector<8x512xf32>
    %8 = arith.addf %3, %7 : vector<8x512xf32>
    %c0_6 = arith.constant 0 : index
    %c0_7 = arith.constant 0 : index
    %9 = vector.load %arg14[%c0_6, %c0_7] : memref<8x512xf32, #tpu.memory_space<vmem>>, vector<8x512xf32>
    tpu.vector_store %arg14[%c0_6, %c0_7], %8 {strides = array<i32>} : memref<8x512xf32, #tpu.memory_space<vmem>>, vector<8x512xf32>,
    %c2_i32 = arith.constant 2 : i32
    %10 = arith.cmpi eq, %arg1, %c2_i32 : i32
    %11 = arith.extui %10 : i1 to i32
    %c0_i32_8 = arith.constant 0 : i32
    %12 = arith.cmpi ne, %11, %c0_i32_8 : i32
    scf.if %12 {
      %c0_9 = arith.constant 0 : index
      %c0_10 = arith.constant 0 : index
      %13 = vector.load %arg2[%c0_9, %c0_10] : memref<8x9xf32, #tpu.memory_space<vmem>>, vector<8x9xf32>
      %14 = arith.truncf %13 : vector<8x9xf32> to vector<8x9xbf16>
      %c0_11 = arith.constant 0 : index
      %c0_12 = arith.constant 0 : index
      %15 = vector.load %arg4[%c0_11, %c0_12] : memref<9x512xbf16, #tpu.memory_space<vmem>>, vector<9x512xbf16>
      %cst_13 = arith.constant dense<0.000000e+00> : vector<8x512xf32>
      %16 = tpu.matmul %14, %15, %cst_13 {dimension_numbers = #tpu.dot_dimension_numbers<[1], [0], [0], [1], [0, 0, 1, 1], [], []>} : vector<8x9xbf16>, vector<9x512xbf16>, vector<8x512xf32> -> vector<8x512xf32>
      %c0_14 = arith.constant 0 : index
      %c0_15 = arith.constant 0 : index
      %17 = vector.load %arg5[%c0_14, %c0_15] : memref<1x512xf32, #tpu.memory_space<vmem>>, vector<1x512xf32>
      %18 = vector.broadcast %17 : vector<1x512xf32> to vector<8x512xf32>
      %19 = arith.addf %16, %18 : vector<8x512xf32>
      %cst_16 = arith.constant 0.000000e+00 : f32
      %20 = vector.broadcast %cst_16 : f32 to vector<8x512xf32>
      %21 = arith.maximumf %19, %20 : vector<8x512xf32>
      %c0_17 = arith.constant 0 : index
      %c0_18 = arith.constant 0 : index
      %22 = vector.load %arg14[%c0_17, %c0_18] : memref<8x512xf32, #tpu.memory_space<vmem>>, vector<8x512xf32>
      %c0_19 = arith.constant 0 : index
      %c0_20 = arith.constant 0 : index
      %23 = vector.load %arg7[%c0_19, %c0_20] : memref<1x512xf32, #tpu.memory_space<vmem>>, vector<1x512xf32>
      %24 = vector.broadcast %23 : vector<1x512xf32> to vector<8x512xf32>
      %25 = arith.addf %22, %24 : vector<8x512xf32>
      %cst_21 = arith.constant 0.000000e+00 : f32
      %26 = vector.broadcast %cst_21 : f32 to vector<8x512xf32>
      %27 = arith.maximumf %25, %26 : vector<8x512xf32>
      %28 = arith.truncf %21 : vector<8x512xf32> to vector<8x512xbf16>
      %c0_22 = arith.constant 0 : index
      %c0_23 = arith.constant 0 : index
      %29 = vector.load %arg8[%c0_22, %c0_23] : memref<512x512xbf16, #tpu.memory_space<vmem>>, vector<512x512xbf16>
      %cst_24 = arith.constant dense<0.000000e+00> : vector<8x512xf32>
      %30 = tpu.matmul %28, %29, %cst_24 {dimension_numbers = #tpu.dot_dimension_numbers<[1], [0], [0], [1], [0, 0, 1, 1], [], []>} : vector<8x512xbf16>, vector<512x512xbf16>, vector<8x512xf32> -> vector<8x512xf32>
      %31 = arith.truncf %27 : vector<8x512xf32> to vector<8x512xbf16>
      %c0_25 = arith.constant 0 : index
      %c0_26 = arith.constant 0 : index
      %32 = vector.load %arg9[%c0_25, %c0_26] : memref<512x512xbf16, #tpu.memory_space<vmem>>, vector<512x512xbf16>
      %cst_27 = arith.constant dense<0.000000e+00> : vector<8x512xf32>
      %33 = tpu.matmul %31, %32, %cst_27 {dimension_numbers = #tpu.dot_dimension_numbers<[1], [0], [0], [1], [0, 0, 1, 1], [], []>} : vector<8x512xbf16>, vector<512x512xbf16>, vector<8x512xf32> -> vector<8x512xf32>
      %34 = arith.addf %30, %33 : vector<8x512xf32>
      %c0_28 = arith.constant 0 : index
      %c0_29 = arith.constant 0 : index
      %35 = vector.load %arg10[%c0_28, %c0_29] : memref<1x512xf32, #tpu.memory_space<vmem>>, vector<1x512xf32>
      %36 = vector.broadcast %35 : vector<1x512xf32> to vector<8x512xf32>
      %37 = arith.addf %34, %36 : vector<8x512xf32>
      %cst_30 = arith.constant 0.000000e+00 : f32
      %38 = vector.broadcast %cst_30 : f32 to vector<8x512xf32>
      %39 = arith.maximumf %37, %38 : vector<8x512xf32>
      %40 = arith.truncf %39 : vector<8x512xf32> to vector<8x512xbf16>
      %c0_31 = arith.constant 0 : index
      %c0_32 = arith.constant 0 : index
      %41 = vector.load %arg11[%c0_31, %c0_32] : memref<512x3xbf16, #tpu.memory_space<vmem>>, vector<512x3xbf16>
      %cst_33 = arith.constant dense<0.000000e+00> : vector<8x3xf32>
      %42 = tpu.matmul %40, %41, %cst_33 {dimension_numbers = #tpu.dot_dimension_numbers<[1], [0], [0], [1], [0, 0, 1, 1], [], []>} : vector<8x512xbf16>, vector<512x3xbf16>, vector<8x3xf32> -> vector<8x3xf32>
      %c0_34 = arith.constant 0 : index
      %c0_35 = arith.constant 0 : index
      %43 = vector.load %arg12[%c0_34, %c0_35] : memref<1x3xf32, #tpu.memory_space<vmem>>, vector<1x3xf32>
      %44 = vector.broadcast %43 : vector<1x3xf32> to vector<8x3xf32>
      %45 = arith.addf %42, %44 : vector<8x3xf32>
      %c0_36 = arith.constant 0 : index
      %c0_37 = arith.constant 0 : index
      %46 = vector.load %arg13[%c0_36, %c0_37] : memref<8x3xf32, #tpu.memory_space<vmem>>, vector<8x3xf32>
      tpu.vector_store %arg13[%c0_36, %c0_37], %45 {strides = array<i32>} : memref<8x3xf32, #tpu.memory_space<vmem>>, vector<8x3xf32>,
    } else {
    }
    return
  }
  func.func @transform_0(%arg0: i32, %arg1: i32) -> (i32, i32) {
    %c0_i32 = arith.constant 0 : i32
    %c0_i32_0 = arith.constant 0 : i32
    return %arg0, %c0_i32 : i32, i32
  }
  func.func @transform_1(%arg0: i32, %arg1: i32) -> (i32, i32) {
    %c0_i32 = arith.constant 0 : i32
    return %arg0, %arg1 : i32, i32
  }
  func.func @transform_2(%arg0: i32, %arg1: i32) -> (i32, i32) {
    %c0_i32 = arith.constant 0 : i32
    %c0_i32_0 = arith.constant 0 : i32
    %c0_i32_1 = arith.constant 0 : i32
    return %c0_i32, %c0_i32_0 : i32, i32
  }
  func.func @transform_3(%arg0: i32, %arg1: i32) -> (i32, i32) {
    %c0_i32 = arith.constant 0 : i32
    %c0_i32_0 = arith.constant 0 : i32
    %c0_i32_1 = arith.constant 0 : i32
    return %c0_i32, %c0_i32_0 : i32, i32
  }
  func.func @transform_4(%arg0: i32, %arg1: i32) -> (i32, i32) {
    %c0_i32 = arith.constant 0 : i32
    %c0_i32_0 = arith.constant 0 : i32
    return %arg1, %c0_i32 : i32, i32
  }
  func.func @transform_5(%arg0: i32, %arg1: i32) -> (i32, i32) {
    %c0_i32 = arith.constant 0 : i32
    %c0_i32_0 = arith.constant 0 : i32
    %c0_i32_1 = arith.constant 0 : i32
    return %c0_i32, %c0_i32_0 : i32, i32
  }
  func.func @transform_6(%arg0: i32, %arg1: i32) -> (i32, i32) {
    %c0_i32 = arith.constant 0 : i32
    %c0_i32_0 = arith.constant 0 : i32
    %c0_i32_1 = arith.constant 0 : i32
    return %c0_i32, %c0_i32_0 : i32, i32
  }
  func.func @transform_7(%arg0: i32, %arg1: i32) -> (i32, i32) {
    %c0_i32 = arith.constant 0 : i32
    %c0_i32_0 = arith.constant 0 : i32
    %c0_i32_1 = arith.constant 0 : i32
    return %c0_i32, %c0_i32_0 : i32, i32
  }
  func.func @transform_8(%arg0: i32, %arg1: i32) -> (i32, i32) {
    %c0_i32 = arith.constant 0 : i32
    %c0_i32_0 = arith.constant 0 : i32
    %c0_i32_1 = arith.constant 0 : i32
    return %c0_i32, %c0_i32_0 : i32, i32
  }
  func.func @transform_9(%arg0: i32, %arg1: i32) -> (i32, i32) {
    %c0_i32 = arith.constant 0 : i32
    %c0_i32_0 = arith.constant 0 : i32
    %c0_i32_1 = arith.constant 0 : i32
    return %c0_i32, %c0_i32_0 : i32, i32
  }
  func.func @transform_10(%arg0: i32, %arg1: i32) -> (i32, i32) {
    %c0_i32 = arith.constant 0 : i32
    %c0_i32_0 = arith.constant 0 : i32
    %c0_i32_1 = arith.constant 0 : i32
    return %c0_i32, %c0_i32_0 : i32, i32
  }
  func.func @transform_11(%arg0: i32, %arg1: i32) -> (i32, i32) {
    %c0_i32 = arith.constant 0 : i32
    %c0_i32_0 = arith.constant 0 : i32
    return %arg0, %c0_i32 : i32, i32
  }
}

</mosaic_0001>

<bundles_post_ra>
// kernel: tpu_custom_call.1
= control target key start
LH: loop header
LB: loop body
LE: loop exit
PB: predicated region body
PF: predicated region fallthrough
CT: control target
= control target key end

     0   :  { %s5237_s0 = inlined_call_operand.vmem [shape: f32[8,9], index: 0, kind: input, shape index: {}]   ;;  %s5238_s1 = inlined_call_operand.vmem [shape: f32[8,768], index: 1, kind: input, shape index: {}]   ;;  %s5239_s2 = inlined_call_operand.vmem [shape: bf16[9,512], index: 2, kind: input, shape index: {}]   ;;  %s5240_s3 = inlined_call_operand.vmem [shape: f32[1,512], index: 3, kind: input, shape index: {}]   ;;  %s5241_s4 = inlined_call_operand.hbm [shape: bf16[768,512], index: 4, kind: input, shape index: {}]   ;;  %s5242_s5 = inlined_call_operand.vmem [shape: f32[1,512], index: 5, kind: input, shape index: {}]   ;;  %s5243_s6 = inlined_call_operand.hbm [shape: bf16[512,512], index: 6, kind: input, shape index: {}]   ;;  %s5244_s7 = inlined_call_operand.hbm [shape: bf16[512,512], index: 7, kind: input, shape index: {}]   ;;  %s5245_s8 = inlined_call_operand.vmem [shape: f32[1,512], index: 8, kind: input, shape index: {}]   ;;  %s5246_s9 = inlined_call_operand.vmem [shape: bf16[512,3], index: 9, kind: input, shape index: {}]   ;;  %s5247_s10 = inlined_call_operand.vmem [shape: f32[1,3], index: 10, kind: input, shape index: {}]   ;;  %s5248_s11 = inlined_call_operand.vmem [shape: f32[8,3], index: 11, kind: output, shape index: {}]  }
   0x1   :  { %5254 = sst [smem:[#allocation10_spill]] %s5245_s8 }
   0x2   :  { %5255 = sst [smem:[#allocation11_spill]] %s5247_s10 }
   0x3   :  { %5256 = sst [smem:[#allocation12_spill]] %s5248_s11 }
   0x4   :  { %16 = vsyncpa [#allocation4], 0 }
   0x5   :  { %18 = vsyncpa [#allocation4 + $0x1], 0 }
   0x6   :  { %19 = vsyncpa [#allocation6], 0  ;;  %s4788_s17 = smov 0   ;;  %s4790_s18 = smov 0  }
   0x7   :  { %s4792_s19 = smov 0   ;;  %s4794_s20 = smov 0  }
   0x8   :  { %s4796_s21 = smov 0   ;;  %s4798_s22 = smov 0  }
   0x9 LB: > { %s3553_s23 = sadd.s32 4294967295, %s4718_s22   ;;  %p153_p0 = scmp.ne.s32.totalorder %s4702_s18, %s4698_s17  ;;  %s4718_s22 = sphi %s4798_s22, %s25_s22   ;;  %s4714_s21 = sphi %s4796_s21, %s5273_s21   ;;  %s4710_s20 = sphi %s4794_s20, %s5272_s20   ;;  %s4706_s19 = sphi %s4792_s19, %s5271_s19   ;;  %s4702_s18 = sphi %s4790_s18, %s5270_s18   ;;  %s4698_s17 = sphi %s4788_s17, %s5269_s17  }
   0xa   : > { %p4818_p1 = scmp.eq.s32.totalorder %s3553_s23, 0  ;;  %p3554_p2 = scmp.ge.s32.totalorder %s4718_s22, 1 }
   0xb   : > { %p316_p3 = scmp.lt.s32.totalorder %s4718_s22, 4  ;;  %s4720_s27 = smov [#allocation5]  }
   0xc   : > { %s5257_s24 = scalar_select %p4818_p1, 1, 0 }
   0xd   : > { %p4826_p4 = por %p4818_p1, %p153_p0  ;;  %p4830_p5 = pnand %p3554_p2, %p316_p3 }
   0xe   : > { %s344_s28 = sshll.u32 %s4720_s27, 4  ;;  %s4721_s30 = smov [#allocation7]   ;;  %s345_s28 = int_to_ptr.vmem [resolvable:$true] %s344_s28 }
   0xf   : > { %s5258_s25 = scalar_select %p4826_p4, 1, 0 }
  0x10   : > { %s5259_s26 = scalar_select %p4830_p5, 1, 0 }
  0x11   : > { %p3989_p6 = pneg %p4830_p5  ;;  %s357_s12 = sshll.u32 %s4721_s30, 4  ;;  %s4842_s12 = int_to_ptr.vmem [resolvable:$true] %s357_s12 }
  0x12   : > { %s4578_s15 = scalar_lea.hbm %s5243_s6, 16384 }
  0x13   : > { %p4838_p7 = pnand %p3989_p6, %p4818_p1  ;;  %p4579_p8 = scmp.ne.s32.totalorder %s5243_s6, %s4578_s15 }
  0x14   : > { %p4585_p12 = scmp.lt.u32.totalorder %s4578_s15, %s5243_s6 }
  0x15   : > { %p4580_p9 = pneg %p4838_p7 }
  0x17   : > { %p4581_p10 = pnand %p4580_p9, %p4579_p8 }
  0x19   : > { %p4582_p11 = pneg %p4581_p10 }
  0x1b   : > { %p4587_p13 = pnand %p4585_p12, %p4582_p11 }
  0x1d   : > { %4590 = shalt.err (!%p4587_p13)
}
  0x1e   : > { %s4591_s30 = scalar_lea.vmem %s345_s28, 16384  ;;  %p4599_p6 = scmp.lt.s32.totalorder %s345_s28, %s345_s28 }
  0x1f   : > { %p4592_p0 = scmp.ne.s32.totalorder %s345_s28, %s4591_s30  ;;  %p4600_p1 = scmp.lt.s32.totalorder %s4591_s30, %s4591_s30 }
  0x21   : > { %p4594_p2 = pnand %p4592_p0, %p4580_p9  ;;  %p4601_p4 = por %p4600_p1, %p4599_p6 }
  0x23   : > { %p4595_p3 = pneg %p4594_p2 }
  0x25   : > { %p4602_p5 = pnand %p4601_p4, %p4595_p3 }
  0x27   : > { %4605 = shalt.err (!%p4602_p5)
}
  0x28   : > { %s5253_s13 = smov 256   ;;  %s4723_s14 = smov 16  }
  0x29   : > { %3992 = dma.hbm_to_vmem [thread:$0]  (!%p4838_p7), %s5243_s6, 16384, %s345_s28, [#allocation6], %s5253_s13, %s5253_s13, %s4723_s14  }
  0x2a   : > { %s4606_s27 = scalar_lea.hbm %s5244_s7, 16384 }
  0x2b   : > { %p4607_p1 = scmp.ne.s32.totalorder %s5244_s7, %s4606_s27  ;;  %p4613_p8 = scmp.lt.u32.totalorder %s4606_s27, %s5244_s7 }
  0x2d   : > { %p4609_p4 = pnand %p4607_p1, %p4580_p9 }
  0x2f   : > { %p4610_p5 = pneg %p4609_p4 }
  0x31   : > { %p4615_p10 = pnand %p4613_p8, %p4610_p5 }
  0x33   : > { %4618 = shalt.err (!%p4615_p10)
}
  0x34   : > { %s4619_s28 = scalar_lea.vmem %s4842_s12, 16384  ;;  %p4627_p0 = scmp.lt.s32.totalorder %s4842_s12, %s4842_s12 }
  0x35   : > { %p4620_p11 = scmp.ne.s32.totalorder %s4842_s12, %s4619_s28  ;;  %p4628_p2 = scmp.lt.s32.totalorder %s4619_s28, %s4619_s28 }
  0x37   : > { %p4622_p12 = pnand %p4620_p11, %p4580_p9  ;;  %p4629_p3 = por %p4628_p2, %p4627_p0 }
  0x39   : > { %p4623_p13 = pneg %p4622_p12 }
  0x3b   : > { %p4630_p6 = pnand %p4629_p3, %p4623_p13 }
  0x3d   : > { %4633 = shalt.err (!%p4630_p6)
}
  0x3e   : > { %3995 = dma.hbm_to_vmem [thread:$0]  (!%p4838_p7), %s5244_s7, 16384, %s4842_s12, [#allocation6], %s5253_s13, %s5253_s13, %s4723_s14  }
  0x3f   : > { %s34_s11 = sadd.s32 1, %s4714_s21  ;;  %s140_s29 = sadd.s32 1, %s4706_s19 }
  0x40   : > { %p35_p9 = scmp.ge.s32.totalorder %s34_s11, 3  ;;  %p147_p1 = scmp.ne.s32.totalorder %s4706_s19, %s4702_s18 }
  0x41   : > { %p148_p4 = scmp.eq.s32.totalorder %s4718_s22, 0  ;;  %p4002_p5 = scmp.lt.s32.totalorder %s4718_s22, 3 }
  0x42   : > { %s5275_s11 = smov (%p35_p9, %s34_s11), 0  ;;  %s393_s15 = sand.u32 1, %s4706_s19  }
  0x43   : > { %p149_p8 = por %p148_p4, %p147_p1  ;;  %s137_s16 = ssub.s32 %s4714_s21, %s5275_s11 }
  0x44   : > { %p138_p10 = scmp.eq.s32.totalorder %s137_s16, 0  ;;  %s3559_s17 = sshll.u32 %s393_s15, 9 }
  0x45   : > { %s3934_s23 = sshll.u32 %s4714_s21, 13  ;;  %s397_s8 = scalar_lea.vmem [#allocation3], %s3559_s17 }
  0x46   : > { %s4910_s27 = scalar_select %p138_p10, %s4706_s19, %s140_s29  }
  0x47   : > { %s4915_s28 = scalar_lea.hbm %s5241_s4, %s3934_s23  ;;  %s405_s10 = sshll.u32 %s397_s8, 4  ;;  %s4917_s10 = int_to_ptr.vmem [resolvable:$true] %s405_s10 }
  0x48   : > { %p4921_p7 = pnand %p4002_p5, %p149_p8  ;;  %s4925_s29 = scalar_lea.sflag [#allocation4], %s393_s15 }
  0x49   : > { %s4634_s30 = scalar_lea.hbm %s4915_s28, 8192  ;;  %s4639_s12 = scalar_lea.hbm %s5241_s4, 24576 }
  0x4a   : > { %p4635_p11 = scmp.ne.s32.totalorder %s4915_s28, %s4634_s30  ;;  %p4636_p12 = pneg %p4921_p7 }
  0x4b   : > { %p4640_p2 = scmp.lt.u32.totalorder %s4915_s28, %s5241_s4  ;;  %p4641_p3 = scmp.lt.u32.totalorder %s4639_s12, %s4634_s30 }
  0x4c   : > { %p4637_p13 = pnand %p4636_p12, %p4635_p11  ;;  %p4643_p9 = scmp.lt.u32.totalorder %s4634_s30, %s4915_s28 }
  0x4d   : > { %p4642_p6 = por %p4641_p3, %p4640_p2 }
  0x4e   : > { %p4638_p0 = pneg %p4637_p13 }
  0x4f   : > { %p4644_p1 = por %p4643_p9, %p4642_p6 }
  0x51   : > { %p4645_p4 = pnand %p4644_p1, %p4638_p0 }
  0x53   : > { %4648 = shalt.err (!%p4645_p4)
}
  0x54   : > { %s4649_s15 = scalar_lea.vmem %s4917_s10, 8192  ;;  %s4724_s17 = smov [#allocation3]  }
  0x55   : > { %p4650_p5 = scmp.ne.s32.totalorder %s4917_s10, %s4649_s15  ;;  %s4654_s23 = sshll.u32 %s4724_s17, 4  ;;  %s4655_s23 = int_to_ptr.vmem [resolvable:$false] %s4654_s23 }
  0x56   : > { %s4656_s13 = scalar_lea.vmem %s4655_s23, 16384  ;;  %p4657_p11 = scmp.lt.s32.totalorder %s4917_s10, %s4655_s23 }
  0x57   : > { %p4652_p8 = pnand %p4650_p5, %p4636_p12  ;;  %p4658_p13 = scmp.lt.s32.totalorder %s4656_s13, %s4649_s15 }
  0x59   : > { %p4653_p10 = pneg %p4652_p8  ;;  %p4659_p2 = por %p4658_p13, %p4657_p11 }
  0x5b   : > { %p4660_p3 = pnand %p4659_p2, %p4653_p10 }
  0x5d   : > { %4663 = shalt.err (!%p4660_p3)
}
  0x5e   : > { %s5262_s30 = smov 256   ;;  %p5263_p12 = scmp.ne.s32.totalorder %s5259_s26, 0 }
  0x5f   : > { %3999 = dma.hbm_to_vmem [thread:$0]  (!%p4921_p7), %s4915_s28, 8192, %s4917_s10, %s4925_s29, %s5262_s30, %s5262_s30, %s4723_s14  }
  0x60   : > { %417 = sbr.rel (%p5263_p12) target bundleno = 1121 (0x461), region = 64  ;;  %s419_s12 = sand.u32 (!%p5263_p12), 1, %s4702_s18  }
  0x61   : > { %s3564_s8 = sshll.u32 (!%p5263_p12), %s419_s12, 9  ;;  %s420_s15 = scalar_lea.sflag (!%p5263_p12), [#allocation4], %s419_s12 }
  0x62   : > { %s4959_s17 = scalar_lea.vmem (!%p5263_p12), [#allocation3], %s3564_s8  ;;  %p5264_p0 = scmp.ne.s32.totalorder (!%p5263_p12), %s5258_s25, 0 }
  0x67   : > { %4689 = dma.done.wait (%p5264_p0), %s420_s15, 8192  }
  0x68   : > { %4691 = vsyncadd (%p5264_p0), %s420_s15, 4294959104  ;;  %p5265_p6 = scmp.ne.s32.totalorder %s5257_s24, 0 }
  0x6a   : > { %4693 = dma.done.wait (%p5265_p6), [#allocation6], 32768  }
  0x6b   : > { %4695 = vsyncadd (%p5265_p6), [#allocation6], 4294934528  ;;  %s3567_s26 = sshll.u32 %s4710_s20, 1  ;;  %p3569_p9 = scmp.ne.s32.totalorder %s4710_s20, 0 }
  0x6c   : > { %p489_p7 = scmp.lt.s32.totalorder %s3567_s26, 5  ;;  %v4725_v0 = vmov (!%p3569_p9), 0.0  }
  0x6d   : > { %505 = sbr.rel (%p3569_p9) target bundleno = 116 (0x74), region = 80  ;;  %506 = vst [vmem:[#allocation2] sm:$0xff] (!%p3569_p9), %v4725_v0  ;;  %507 = vst [vmem:[#allocation2 + $0x8] sm:$0xff] (!%p3569_p9), %v4725_v0 }
  0x6e   : > { %s5277_s26 = smov (!%p489_p7, %s3567_s26), 5  ;;  %508 = vst [vmem:[#allocation2 + $0x10] sm:$0xff] (!%p3569_p9), %v4725_v0  ;;  %509 = vst [vmem:[#allocation2 + $0x18] sm:$0xff] (!%p3569_p9), %v4725_v0 }
  0x6f   : > { %s3568_s14 = sshll.u32 %s5277_s26, 3 }
  0x70   : > { %s4973_s16 = scalar_lea.vmem %s5238_s1, %s3568_s14 }
  0x74 PF: > { %v4060_v1 = vld [vmem:[%s4959_s17 + $0x4] ss:$16 sps:$4 sm:$0xff]   ;;  %v4062_v2 = vld [vmem:[%s4959_s17 + $0xc] ss:$16 sps:$4 sm:$0xff]   ;;  %v4064_v3 = vld [vmem:[%s4959_s17] ss:$16 sps:$4 sm:$0xff]  }
  0x75   : > { %902 = vmatprep.subr.bf16.mxu0 %v4060_v1  ;;  %v4065_v4 = vld [vmem:[%s4959_s17 + $0x8] ss:$16 sps:$4 sm:$0xff]   ;;  %943 = vmatprep.subr.bf16.mxu1 %v4062_v2  ;;  %v4066_v5 = vld [vmem:[%s4959_s17 + $0x24] ss:$16 sps:$4 sm:$0xff]   ;;  %v4068_v6 = vld [vmem:[%s4959_s17 + $0x2c] ss:$16 sps:$4 sm:$0xff]  }
  0x76   : > { %903 = vmatpush1.bf16.msra.mxu0 %v4064_v3  ;;  %944 = vmatpush1.bf16.msra.mxu1 %v4065_v4  ;;  %v4070_v7 = vld [vmem:[%s4959_s17 + $0x20] ss:$16 sps:$4 sm:$0xff]   ;;  %v4071_v8 = vld [vmem:[%s4959_s17 + $0x28] ss:$16 sps:$4 sm:$0xff]   ;;  %v4072_v9 = vld [vmem:[%s4959_s17 + $0x44] ss:$16 sps:$4 sm:$0xff]  }
  0x77   : > { %904 = vmatprep.subr.bf16.mxu0 %v4066_v5  ;;  %945 = vmatprep.subr.bf16.mxu1 %v4068_v6  ;;  %v4074_v10 = vld [vmem:[%s4959_s17 + $0x4c] ss:$16 sps:$4 sm:$0xff]   ;;  %v4076_v11 = vld [vmem:[%s4959_s17 + $0x40] ss:$16 sps:$4 sm:$0xff]   ;;  %v4077_v12 = vld [vmem:[%s4959_s17 + $0x48] ss:$16 sps:$4 sm:$0xff]  }
  0x78   : > { %v4078_v13 = vld [vmem:[%s4959_s17 + $0x64] ss:$16 sps:$4 sm:$0xff]   ;;  %v4080_v14 = vld [vmem:[%s4959_s17 + $0x6c] ss:$16 sps:$4 sm:$0xff]   ;;  %v4082_v15 = vld [vmem:[%s4959_s17 + $0x60] ss:$16 sps:$4 sm:$0xff]  }
  0x79   : > { %v4083_v16 = vld [vmem:[%s4959_s17 + $0x68] ss:$16 sps:$4 sm:$0xff]   ;;  %v4084_v17 = vld [vmem:[%s4959_s17 + $0x84] ss:$16 sps:$4 sm:$0xff]   ;;  %v4086_v18 = vld [vmem:[%s4959_s17 + $0x8c] ss:$16 sps:$4 sm:$0xff]  }
  0x7a   : > { %905 = vmatpush1.bf16.msra.mxu0 %v4070_v7  ;;  %946 = vmatpush1.bf16.msra.mxu1 %v4071_v8  ;;  %v4088_v19 = vld [vmem:[%s4959_s17 + $0x80] ss:$16 sps:$4 sm:$0xff]   ;;  %v4089_v20 = vld [vmem:[%s4959_s17 + $0x88] ss:$16 sps:$4 sm:$0xff]   ;;  %v4090_v21 = vld [vmem:[%s4959_s17 + $0xa4] ss:$16 sps:$4 sm:$0xff]  }
  0x7b   : > { %906 = vmatprep.subr.bf16.mxu0 %v4072_v9  ;;  %947 = vmatprep.subr.bf16.mxu1 %v4074_v10  ;;  %v4092_v22 = vld [vmem:[%s4959_s17 + $0xac] ss:$16 sps:$4 sm:$0xff]   ;;  %v4094_v23 = vld [vmem:[%s4959_s17 + $0xa0] ss:$16 sps:$4 sm:$0xff]   ;;  %v4095_v24 = vld [vmem:[%s4959_s17 + $0xa8] ss:$16 sps:$4 sm:$0xff]  }
  0x7c   : > { %v4096_v25 = vld [vmem:[%s4959_s17 + $0xc4] ss:$16 sps:$4 sm:$0xff]   ;;  %v4098_v26 = vld [vmem:[%s4959_s17 + $0xcc] ss:$16 sps:$4 sm:$0xff]   ;;  %v4100_v27 = vld [vmem:[%s4959_s17 + $0xc0] ss:$16 sps:$4 sm:$0xff]  }
  0x7d   : > { %v4101_v28 = vld [vmem:[%s4959_s17 + $0xc8] ss:$16 sps:$4 sm:$0xff]   ;;  %v4102_v29 = vld [vmem:[%s4959_s17 + $0xe4] ss:$16 sps:$4 sm:$0xff]   ;;  %v4104_v30 = vld [vmem:[%s4959_s17 + $0xec] ss:$16 sps:$4 sm:$0xff]  }
  0x7e   : > { %907 = vmatpush1.bf16.msra.mxu0 %v4076_v11  ;;  %948 = vmatpush1.bf16.msra.mxu1 %v4077_v12  ;;  %v4106_v31 = vld [vmem:[%s4959_s17 + $0xe0] ss:$16 sps:$4 sm:$0xff]   ;;  %v4107_v32 = vld [vmem:[%s4959_s17 + $0xe8] ss:$16 sps:$4 sm:$0xff]   ;;  %v4108_v33 = vld [vmem:[%s4959_s17 + $0x104] ss:$16 sps:$4 sm:$0xff]  }
  0x7f   : > { %908 = vmatprep.subr.bf16.mxu0 %v4078_v13  ;;  %949 = vmatprep.subr.bf16.mxu1 %v4080_v14  ;;  %v4110_v34 = vld [vmem:[%s4959_s17 + $0x10c] ss:$16 sps:$4 sm:$0xff]   ;;  %v4112_v35 = vld [vmem:[%s4959_s17 + $0x100] ss:$16 sps:$4 sm:$0xff]   ;;  %v4113_v36 = vld [vmem:[%s4959_s17 + $0x108] ss:$16 sps:$4 sm:$0xff]  }
  0x80   : > { %v4114_v37 = vld [vmem:[%s4959_s17 + $0x124] ss:$16 sps:$4 sm:$0xff]   ;;  %v4116_v38 = vld [vmem:[%s4959_s17 + $0x12c] ss:$16 sps:$4 sm:$0xff]   ;;  %v4118_v39 = vld [vmem:[%s4959_s17 + $0x120] ss:$16 sps:$4 sm:$0xff]  }
  0x81   : > { %v4119_v40 = vld [vmem:[%s4959_s17 + $0x128] ss:$16 sps:$4 sm:$0xff]   ;;  %v4120_v41 = vld [vmem:[%s4959_s17 + $0x144] ss:$16 sps:$4 sm:$0xff]   ;;  %v4122_v42 = vld [vmem:[%s4959_s17 + $0x14c] ss:$16 sps:$4 sm:$0xff]  }
  0x82   : > { %909 = vmatpush1.bf16.msra.mxu0 %v4082_v15  ;;  %950 = vmatpush1.bf16.msra.mxu1 %v4083_v16  ;;  %v4124_v43 = vld [vmem:[%s4959_s17 + $0x140] ss:$16 sps:$4 sm:$0xff]   ;;  %v4125_v44 = vld [vmem:[%s4959_s17 + $0x148] ss:$16 sps:$4 sm:$0xff]   ;;  %v4126_v45 = vld [vmem:[%s4959_s17 + $0x164] ss:$16 sps:$4 sm:$0xff]  }
  0x83   : > { %910 = vmatprep.subr.bf16.mxu0 %v4084_v17  ;;  %951 = vmatprep.subr.bf16.mxu1 %v4086_v18  ;;  %v4128_v46 = vld [vmem:[%s4959_s17 + $0x16c] ss:$16 sps:$4 sm:$0xff]   ;;  %v4130_v49 = vld [vmem:[%s4959_s17 + $0x160] ss:$16 sps:$4 sm:$0xff]   ;;  %v4131_v50 = vld [vmem:[%s4959_s17 + $0x168] ss:$16 sps:$4 sm:$0xff]  }
  0x84   : > { %v515_v47 = vld [vmem:[%s4973_s16 + $0x8] sm:$0xff]  ;;  %v4132_v51 = vld [vmem:[%s4959_s17 + $0x184] ss:$16 sps:$4 sm:$0xff]   ;;  %v4136_v53 = vld [vmem:[%s4959_s17 + $0x180] ss:$16 sps:$4 sm:$0xff]   ;;  %p3634_p1 = scmp.ne.s32.totalorder %s4710_s20, 2 }
  0x85   : > { %v517_v48 = vpack.c.bf16 %v515_v47, %v515_v47  ;;  %v4134_v52 = vld [vmem:[%s4959_s17 + $0x18c] ss:$16 sps:$4 sm:$0xff]   ;;  %v4137_v54 = vld [vmem:[%s4959_s17 + $0x188] ss:$16 sps:$4 sm:$0xff]   ;;  %v4138_v55 = vld [vmem:[%s4959_s17 + $0x1a4] ss:$16 sps:$4 sm:$0xff]  }
  0x86   : > { %911 = vmatpush1.bf16.msra.mxu0 %v4088_v19  ;;  %952 = vmatpush1.bf16.msra.mxu1 %v4089_v20  ;;  %v4140_v56 = vld [vmem:[%s4959_s17 + $0x1ac] ss:$16 sps:$4 sm:$0xff]   ;;  %v4142_v57 = vld [vmem:[%s4959_s17 + $0x1a0] ss:$16 sps:$4 sm:$0xff]   ;;  %v4143_v58 = vld [vmem:[%s4959_s17 + $0x1a8] ss:$16 sps:$4 sm:$0xff]  }
  0x87   : > { %912 = vmatprep.subr.bf16.mxu0 %v4090_v21  ;;  %953 = vmatprep.subr.bf16.mxu1 %v4092_v22  ;;  %v4144_v59 = vld [vmem:[%s4959_s17 + $0x1c4] ss:$16 sps:$4 sm:$0xff]   ;;  %v4146_v60 = vld [vmem:[%s4959_s17 + $0x1cc] ss:$16 sps:$4 sm:$0xff]   ;;  %v4148_v61 = vld [vmem:[%s4959_s17 + $0x1c0] ss:$16 sps:$4 sm:$0xff]  }
  0x88   : > { %934 = vmatprep.mubr.bf16.mxu0 %v517_v48  ;;  %975 = vmatprep.mubr.bf16.mxu1 %v517_v48  ;;  %v4149_v62 = vld [vmem:[%s4959_s17 + $0x1c8] ss:$16 sps:$4 sm:$0xff]   ;;  %v4150_v63 = vld [vmem:[%s4959_s17 + $0x1e4] ss:$16 sps:$4 sm:$0xff]   ;;  %v4152_v0 = vld [vmem:[%s4959_s17 + $0x1ec] ss:$16 sps:$4 sm:$0xff]  }
  0x89   : > { %v4154_v1 = vld [vmem:[%s4959_s17 + $0x1e0] ss:$16 sps:$4 sm:$0xff]   ;;  %v4155_v2 = vld [vmem:[%s4959_s17 + $0x1e8] ss:$16 sps:$4 sm:$0xff]   ;;  %vm1044_vm0 = vcmask (!%p3634_p1), 1043456   ;;  %vm1045_vm1 = vcmask (!%p3634_p1), 1044480  }
  0x8a   : > { %913 = vmatpush1.bf16.msra.mxu0 %v4094_v23  ;;  %954 = vmatpush1.bf16.msra.mxu1 %v4095_v24  ;;  %v514_v3 = vld [vmem:[%s4973_s16] sm:$0xff]  ;;  %v512_v6 = vld [vmem:[#allocation2 + $0x10] sm:$0xff]  ;;  %v511_v7 = vld [vmem:[#allocation2 + $0x8] sm:$0xff]  ;;  %v4726_v22 = vmov (!%p3634_p1), 65535   ;;  %vm1040_vm2 = vcmask (!%p3634_p1), 72704   ;;  %s5266_s24 = sld [smem:[#allocation10_spill]] (!%p3634_p1) }
  0x8b   : > { %914 = vmatprep.subr.bf16.mxu0 %v4096_v25  ;;  %955 = vmatprep.subr.bf16.mxu1 %v4098_v26  ;;  %v516_v4 = vpack.c.bf16 %v514_v3, %v514_v3  ;;  %v510_v5 = vld [vmem:[#allocation2] sm:$0xff]  ;;  %v513_v8 = vld [vmem:[#allocation2 + $0x18] sm:$0xff]  ;;  %v1046_v23 = vsel (!%p3634_p1), %vm1044_vm0, 4294967295, %v4726_v22  ;;  %s5267_s23 = sld [smem:[#allocation11_spill]] (!%p3634_p1)  ;;  %vm3429_vm3 = vcmask (!%p3634_p1), 23552   ;;  %s5268_s20 = sld [smem:[#allocation12_spill]] (!%p3634_p1) }
  0x8c   : > { %v4156_v21 = vld [vmem:[%s5239_s2 + $0x4] ss:$16 sps:$4 sm:$0x1f] (!%p3634_p1)   ;;  %v4158_v24 = vld [vmem:[%s5239_s2 + $0xc] ss:$16 sps:$4 sm:$0x1f] (!%p3634_p1)  }
  0x8d   : > { %v1047_v25 = vsel (!%p3634_p1), %vm1045_vm1, %v1046_v23, 0  ;;  %v4160_v26 = vld [vmem:[%s5239_s2] ss:$16 sps:$4 sm:$0x1f] (!%p3634_p1)   ;;  %v4182_v47 = vld [vmem:[#allocation7 + $0x64] ss:$16 sps:$4 sm:$0xff] (!%p3634_p1)  }
  0x8e   : > { %915 = vmatpush1.bf16.msra.mxu0 %v4100_v27  ;;  %956 = vmatpush1.bf16.msra.mxu1 %v4101_v28  ;;  %v4727_v27 = vmov (!%p3634_p1), 0   ;;  %v996_v28 = vld [vmem:[%s5237_s0] sm:$0xff] (!%p3634_p1) }
  0x8f   : > { %916 = vmatprep.subr.bf16.mxu0 %v4102_v29  ;;  %957 = vmatprep.subr.bf16.mxu1 %v4104_v30  ;;  %v1052_v29 = vand.u32 (!%p3634_p1), %v4156_v21, %v1047_v25  ;;  %v1058_v30 = vand.u32 (!%p3634_p1), %v4158_v24, %v1047_v25  ;;  %v4185_v48 = vld [vmem:[#allocation7 + $0x264] ss:$16 sps:$4 sm:$0xff] (!%p3634_p1)  }
  0x90   : > { %v4212_v3 = vld [vmem:[#allocation7 + $0x104] ss:$16 sps:$4 sm:$0xff] (!%p3634_p1)  }
  0x91   : > { %v4230_v21 = vld [vmem:[#allocation7 + $0x164] ss:$16 sps:$4 sm:$0xff] (!%p3634_p1)  }
  0x92   : > { %917 = vmatpush1.bf16.msra.mxu0 %v4106_v31  ;;  %958 = vmatpush1.bf16.msra.mxu1 %v4107_v32  ;;  %v4161_v31 = vld [vmem:[%s5239_s2 + $0x8] ss:$16 sps:$4 sm:$0x1f] (!%p3634_p1)   ;;  %v1049_v32 = vand.u32 (!%p3634_p1), %v4160_v26, %v1047_v25  ;;  %v4233_v24 = vld [vmem:[#allocation7 + $0x364] ss:$16 sps:$4 sm:$0xff] (!%p3634_p1)  }
  0x93   : > { %918 = vmatprep.subr.bf16.mxu0 %v4108_v33  ;;  %959 = vmatprep.subr.bf16.mxu1 %v4110_v34  ;;  %v4164_v33 = vld [vmem:[#allocation7 + $0x4] ss:$16 sps:$4 sm:$0xff] (!%p3634_p1)   ;;  %v1055_v34 = vand.u32 (!%p3634_p1), %v4161_v31, %v1047_v25  ;;  %v4228_v26 = vld [vmem:[#allocation7 + $0x160] ss:$16 sps:$4 sm:$0xff] (!%p3634_p1)  }
  0x96   : > { %919 = vmatpush1.bf16.msra.mxu0 %v4112_v35  ;;  %960 = vmatpush1.bf16.msra.mxu1 %v4113_v36  ;;  %v997_v35 = vpack.c.bf16 (!%p3634_p1), %v996_v28, %v996_v28  ;;  %v4167_v36 = vld [vmem:[#allocation7 + $0x204] ss:$16 sps:$4 sm:$0xff] (!%p3634_p1)  }
  0x97   : > { %920 = vmatprep.subr.bf16.mxu0 %v4114_v37  ;;  %961 = vmatprep.subr.bf16.mxu1 %v4116_v38  ;;  %v4162_v37 = vld [vmem:[#allocation7] ss:$16 sps:$4 sm:$0xff] (!%p3634_p1)  }
  0x98   : > { %v4165_v38 = vld [vmem:[#allocation7 + $0x200] ss:$16 sps:$4 sm:$0xff] (!%p3634_p1)  }
  0x9a   : > { %921 = vmatpush1.bf16.msra.mxu0 %v4118_v39  ;;  %962 = vmatpush1.bf16.msra.mxu1 %v4119_v40  ;;  %v4170_v39 = vld [vmem:[#allocation7 + $0x24] ss:$16 sps:$4 sm:$0xff] (!%p3634_p1)  }
  0x9b   : > { %922 = vmatprep.subr.bf16.mxu0 %v4120_v41  ;;  %963 = vmatprep.subr.bf16.mxu1 %v4122_v42  ;;  %v4173_v40 = vld [vmem:[#allocation7 + $0x224] ss:$16 sps:$4 sm:$0xff] (!%p3634_p1)   ;;  %v4168_v41 = vld [vmem:[#allocation7 + $0x20] ss:$16 sps:$4 sm:$0xff] (!%p3634_p1)  }
  0x9c   : > { %v4171_v42 = vld [vmem:[#allocation7 + $0x220] ss:$16 sps:$4 sm:$0xff] (!%p3634_p1)  }
  0x9e   : > { %923 = vmatpush1.bf16.msra.mxu0 %v4124_v43  ;;  %964 = vmatpush1.bf16.msra.mxu1 %v4125_v44  ;;  %v4176_v43 = vld [vmem:[#allocation7 + $0x44] ss:$16 sps:$4 sm:$0xff] (!%p3634_p1)  }
  0x9f   : > { %924 = vmatprep.subr.bf16.mxu0 %v4126_v45  ;;  %965 = vmatprep.subr.bf16.mxu1 %v4128_v46  ;;  %v4179_v44 = vld [vmem:[#allocation7 + $0x244] ss:$16 sps:$4 sm:$0xff] (!%p3634_p1)   ;;  %v4174_v45 = vld [vmem:[#allocation7 + $0x40] ss:$16 sps:$4 sm:$0xff] (!%p3634_p1)  }
  0xa0   : > { %v4177_v46 = vld [vmem:[#allocation7 + $0x240] ss:$16 sps:$4 sm:$0xff] (!%p3634_p1)  }
  0xa2   : > { %925 = vmatpush1.bf16.msra.mxu0 %v4130_v49  ;;  %966 = vmatpush1.bf16.msra.mxu1 %v4131_v50  ;;  %v4180_v49 = vld [vmem:[#allocation7 + $0x60] ss:$16 sps:$4 sm:$0xff] (!%p3634_p1)  }
  0xa3   : > { %926 = vmatprep.subr.bf16.mxu0 %v4132_v51  ;;  %967 = vmatprep.subr.bf16.mxu1 %v4134_v52  ;;  %v4183_v50 = vld [vmem:[#allocation7 + $0x260] ss:$16 sps:$4 sm:$0xff] (!%p3634_p1)   ;;  %v4188_v51 = vld [vmem:[#allocation7 + $0x84] ss:$16 sps:$4 sm:$0xff] (!%p3634_p1)  }
  0xa4   : > { %v4191_v52 = vld [vmem:[#allocation7 + $0x284] ss:$16 sps:$4 sm:$0xff] (!%p3634_p1)  }
  0xa6   : > { %927 = vmatpush1.bf16.msra.mxu0 %v4136_v53  ;;  %968 = vmatpush1.bf16.msra.mxu1 %v4137_v54  ;;  %v4186_v53 = vld [vmem:[#allocation7 + $0x80] ss:$16 sps:$4 sm:$0xff] (!%p3634_p1)  }
  0xa7   : > { %928 = vmatprep.subr.bf16.mxu0 %v4138_v55  ;;  %969 = vmatprep.subr.bf16.mxu1 %v4140_v56  ;;  %v4189_v54 = vld [vmem:[#allocation7 + $0x280] ss:$16 sps:$4 sm:$0xff] (!%p3634_p1)   ;;  %v4194_v55 = vld [vmem:[#allocation7 + $0xa4] ss:$16 sps:$4 sm:$0xff] (!%p3634_p1)  }
  0xa8   : > { %v4197_v56 = vld [vmem:[#allocation7 + $0x2a4] ss:$16 sps:$4 sm:$0xff] (!%p3634_p1)  }
  0xaa   : > { %929 = vmatpush1.bf16.msra.mxu0 %v4142_v57  ;;  %970 = vmatpush1.bf16.msra.mxu1 %v4143_v58  ;;  %v4192_v57 = vld [vmem:[#allocation7 + $0xa0] ss:$16 sps:$4 sm:$0xff] (!%p3634_p1)  }
  0xab   : > { %930 = vmatprep.subr.bf16.mxu0 %v4144_v59  ;;  %971 = vmatprep.subr.bf16.mxu1 %v4146_v60  ;;  %v4195_v58 = vld [vmem:[#allocation7 + $0x2a0] ss:$16 sps:$4 sm:$0xff] (!%p3634_p1)   ;;  %v4200_v59 = vld [vmem:[#allocation7 + $0xc4] ss:$16 sps:$4 sm:$0xff] (!%p3634_p1)  }
  0xac   : > { %v4203_v60 = vld [vmem:[#allocation7 + $0x2c4] ss:$16 sps:$4 sm:$0xff] (!%p3634_p1)  }
  0xae   : > { %931 = vmatpush1.bf16.msra.mxu0 %v4148_v61  ;;  %972 = vmatpush1.bf16.msra.mxu1 %v4149_v62  ;;  %v4198_v61 = vld [vmem:[#allocation7 + $0xc0] ss:$16 sps:$4 sm:$0xff] (!%p3634_p1)  }
  0xaf   : > { %932 = vmatprep.subr.bf16.mxu0 %v4150_v63  ;;  %973 = vmatprep.subr.bf16.mxu1 %v4152_v0  ;;  %v4201_v62 = vld [vmem:[#allocation7 + $0x2c0] ss:$16 sps:$4 sm:$0xff] (!%p3634_p1)   ;;  %v4206_v63 = vld [vmem:[#allocation7 + $0xe4] ss:$16 sps:$4 sm:$0xff] (!%p3634_p1)  }
  0xb0   : > { %v4209_v0 = vld [vmem:[#allocation7 + $0x2e4] ss:$16 sps:$4 sm:$0xff] (!%p3634_p1)  }
  0xb2   : > { %933 = vmatpush1.bf16.msra.mxu0 %v4154_v1  ;;  %974 = vmatpush1.bf16.msra.mxu1 %v4155_v2  ;;  %v4204_v1 = vld [vmem:[#allocation7 + $0xe0] ss:$16 sps:$4 sm:$0xff] (!%p3634_p1)  }
  0xb3   : > { %1060 = vmatprep.subr.bf16.mxu0 (!%p3634_p1), %v1052_v29  ;;  %1101 = vmatprep.subr.bf16.mxu1 (!%p3634_p1), %v1058_v30  ;;  %v4207_v2 = vld [vmem:[#allocation7 + $0x2e0] ss:$16 sps:$4 sm:$0xff] (!%p3634_p1)   ;;  %v4236_v30 = vld [vmem:[#allocation7 + $0x184] ss:$16 sps:$4 sm:$0xff] (!%p3634_p1)  }
  0xb4   : > { %v4231_v29 = vld [vmem:[#allocation7 + $0x360] ss:$16 sps:$4 sm:$0xff] (!%p3634_p1)  }
  0xb5   : > { %935 = vmatmul.mubr.bf16.vlgmr.msra.gmra.mrb[0].mxu0 %v516_v4  ;;  %976 = vmatmul.mubr.bf16.vlgmr.msra.gmra.mrb[0].mxu1 %v516_v4  ;;  %v1004_v4 = vlaneseq (!%p3634_p1) }
  0xb6   : > { %1092 = vmatprep.mubr.bf16.mxu0 (!%p3634_p1), %v4727_v27  ;;  %1133 = vmatprep.mubr.bf16.mxu1 (!%p3634_p1), %v4727_v27 }
  0xb7   : > { %1061 = vmatpush1.bf16.msra.mxu0 (!%p3634_p1), %v1049_v32  ;;  %1102 = vmatpush1.bf16.msra.mxu1 (!%p3634_p1), %v1055_v34 }
  0xb8   : > { %2084 = vmatprep.subr.bf16.mxu0 (!%p3634_p1), %v4164_v33  ;;  %2125 = vmatprep.subr.bf16.mxu1 (!%p3634_p1), %v4167_v36  ;;  %v4239_v33 = vld [vmem:[#allocation7 + $0x384] ss:$16 sps:$4 sm:$0xff] (!%p3634_p1)  }
 0x186   : > { %995 = sbr.rel (%p3634_p1) target bundleno = 1121 (0x461), region = 84 }
 0x188   : > { %v936_v9 = vpop.f32.mrb[0].mxu0  ;;  %v977_v10 = vpop.f32.mrb[0].mxu1 }
 0x189   : > { %v984_v11 = vadd.f32 %v936_v9, %v510_v5  ;;  %v986_v12 = vadd.f32 %v977_v10, %v512_v6  ;;  %v938_v13 = vpop.f32.mrb[1].mxu0  ;;  %v979_v14 = vpop.f32.mrb[1].mxu1  ;;  %v4215_v5 = vld [vmem:[#allocation7 + $0x304] ss:$16 sps:$4 sm:$0xff] (!%p3634_p1)   ;;  %v4210_v6 = vld [vmem:[#allocation7 + $0x100] ss:$16 sps:$4 sm:$0xff] (!%p3634_p1)  }
 0x18a   : > { %v985_v15 = vadd.f32 %v938_v13, %v511_v7  ;;  %v987_v16 = vadd.f32 %v979_v14, %v513_v8  ;;  %v940_v17 = vpop.f32.mrb[2].mxu0  ;;  %v981_v18 = vpop.f32.mrb[2].mxu1  ;;  %v4213_v7 = vld [vmem:[#allocation7 + $0x300] ss:$16 sps:$4 sm:$0xff] (!%p3634_p1)   ;;  %v4218_v8 = vld [vmem:[#allocation7 + $0x124] ss:$16 sps:$4 sm:$0xff] (!%p3634_p1)  }
 0x18b   : > { %988 = vst [vmem:[#allocation2] sm:$0xff] %v984_v11  ;;  %990 = vst [vmem:[#allocation2 + $0x10] sm:$0xff] %v986_v12  ;;  %v941_v19 = vpop.f32.mrb[3].mxu0  ;;  %v982_v20 = vpop.f32.mrb[3].mxu1  ;;  %3639 = vmatmul.mubr.msk.bf16.vlgmr.msra.gmra.mrb[0].mxu0 (!%p3634_p1), %vm1040_vm2, %v997_v35  ;;  %3640 = vmatmul.mubr.msk.bf16.vlgmr.msra.gmra.mrb[0].mxu1 (!%p3634_p1), %vm1040_vm2, %v997_v35  ;;  %v1005_v9 = vshrl.u32 (!%p3634_p1), %v1004_v4, 7 }
 0x18c   : > { %989 = vst [vmem:[#allocation2 + $0x8] sm:$0xff] %v985_v15  ;;  %991 = vst [vmem:[#allocation2 + $0x18] sm:$0xff] %v987_v16  ;;  %2085 = vmatpush1.bf16.msra.mxu0 (!%p3634_p1), %v4162_v37  ;;  %2126 = vmatpush1.bf16.msra.mxu1 (!%p3634_p1), %v4165_v38  ;;  %v4221_v10 = vld [vmem:[#allocation7 + $0x324] ss:$16 sps:$4 sm:$0xff] (!%p3634_p1)   ;;  %v4216_v11 = vld [vmem:[#allocation7 + $0x120] ss:$16 sps:$4 sm:$0xff] (!%p3634_p1)  }
 0x18d   : > { %2086 = vmatprep.subr.bf16.mxu0 %v4170_v39  ;;  %2127 = vmatprep.subr.bf16.mxu1 %v4173_v40  ;;  %v4219_v12 = vld [vmem:[#allocation7 + $0x320] ss:$16 sps:$4 sm:$0xff]   ;;  %v4224_v13 = vld [vmem:[#allocation7 + $0x144] ss:$16 sps:$4 sm:$0xff]   ;;  %v5058_v14 = vsub.s32 1, %v1005_v9  ;;  %v5060_v15 = vsub.s32 3, %v1005_v9 }
 0x18e   : > { %v4227_v16 = vld [vmem:[#allocation7 + $0x344] ss:$16 sps:$4 sm:$0xff]   ;;  %v4222_v17 = vld [vmem:[#allocation7 + $0x140] ss:$16 sps:$4 sm:$0xff]   ;;  %v5069_v35 = vsub.s32 0, %v1005_v9  ;;  %v5073_v38 = vsub.s32 2, %v1005_v9 }
 0x18f   : > { %v1150_v19 = vld [vmem:[%s5242_s5] sm:$0xf]  ;;  %v4242_v40 = vld [vmem:[#allocation7 + $0x1a4] ss:$16 sps:$4 sm:$0xff]   ;;  %v4264_v4 = vld [vmem:[#allocation7 + $0x28] ss:$16 sps:$4 sm:$0xff]  }
 0x190   : > { %2087 = vmatpush1.bf16.msra.mxu0 %v4168_v41  ;;  %2128 = vmatpush1.bf16.msra.mxu1 %v4171_v42  ;;  %v4225_v20 = vld [vmem:[#allocation7 + $0x340] ss:$16 sps:$4 sm:$0xff]   ;;  %v1159_v22 = vrot.slane %v1150_v19, %v5058_v14  ;;  %v1167_v23 = vrot.slane %v1150_v19, %v5060_v15  ;;  %v4245_v42 = vld [vmem:[#allocation7 + $0x3a4] ss:$16 sps:$4 sm:$0xff]   ;;  %v4273_v9 = vld [vmem:[#allocation7 + $0x248] ss:$16 sps:$4 sm:$0xff]  }
 0x191   : > { %2088 = vmatprep.subr.bf16.mxu0 %v4176_v43  ;;  %2129 = vmatprep.subr.bf16.mxu1 %v4179_v44  ;;  %v4234_v37 = vld [vmem:[#allocation7 + $0x180] ss:$16 sps:$4 sm:$0xff]   ;;  %v1155_v44 = vrot.slane %v1150_v19, %v5069_v35 }
 0x192   : > { %v4237_v39 = vld [vmem:[#allocation7 + $0x380] ss:$16 sps:$4 sm:$0xff]  }
 0x193   : > { %v1147_v18 = vld [vmem:[#allocation2 + $0x8] sm:$0xff]  ;;  %v1149_v25 = vld [vmem:[#allocation2 + $0x18] sm:$0xff]  ;;  %v4240_v41 = vld [vmem:[#allocation7 + $0x1a0] ss:$16 sps:$4 sm:$0xff]  }
 0x194   : > { %2089 = vmatpush1.bf16.msra.mxu0 %v4174_v45  ;;  %2130 = vmatpush1.bf16.msra.mxu1 %v4177_v46  ;;  %v1173_v27 = vadd.f32 %v1159_v22, %v1147_v18  ;;  %v1175_v28 = vadd.f32 %v1167_v23, %v1149_v25  ;;  %v4243_v43 = vld [vmem:[#allocation7 + $0x3a0] ss:$16 sps:$4 sm:$0xff]   ;;  %v1163_v46 = vrot.slane %v1150_v19, %v5073_v38  ;;  %v4282_v18 = vld [vmem:[#allocation7 + $0x88] ss:$16 sps:$4 sm:$0xff]   ;;  %v4299_v25 = vld [vmem:[#allocation7 + $0x2cc] ss:$16 sps:$4 sm:$0xff]  }
 0x195   : > { %2090 = vmatprep.subr.bf16.mxu0 %v4182_v47  ;;  %2131 = vmatprep.subr.bf16.mxu1 %v4185_v48  ;;  %v1146_v45 = vld [vmem:[#allocation2] sm:$0xff]  ;;  %v1148_v48 = vld [vmem:[#allocation2 + $0x10] sm:$0xff]  ;;  %v4285_v19 = vld [vmem:[#allocation7 + $0x288] ss:$16 sps:$4 sm:$0xff]  }
 0x196   : > { %v1177_v31 = vmax.f32 %v1173_v27, 0.0  ;;  %v1179_v32 = vmax.f32 %v1175_v28, 0.0  ;;  %v4248_v47 = vld [vmem:[#allocation7 + $0x1c4] ss:$16 sps:$4 sm:$0xff]   ;;  %v4288_v22 = vld [vmem:[#allocation7 + $0xa8] ss:$16 sps:$4 sm:$0xff]  }
 0x197   : > { %v4291_v23 = vld [vmem:[#allocation7 + $0x2a8] ss:$16 sps:$4 sm:$0xff]   ;;  %v4302_v28 = vld [vmem:[#allocation7 + $0xec] ss:$16 sps:$4 sm:$0xff]  }
 0x198   : > { %2091 = vmatpush1.bf16.msra.mxu0 %v4180_v49  ;;  %2132 = vmatpush1.bf16.msra.mxu1 %v4183_v50  ;;  %v5067_v34 = vpack.c.bf16 %v1177_v31, %v1177_v31  ;;  %v5071_v36 = vpack.c.bf16 %v1179_v32, %v1179_v32  ;;  %v4251_v49 = vld [vmem:[#allocation7 + $0x3c4] ss:$16 sps:$4 sm:$0xff]   ;;  %v1172_v50 = vadd.f32 %v1155_v44, %v1146_v45  ;;  %v4297_v27 = vld [vmem:[#allocation7 + $0x2c8] ss:$16 sps:$4 sm:$0xff]   ;;  %v4308_v32 = vld [vmem:[#allocation7 + $0x10c] ss:$16 sps:$4 sm:$0xff]  }
 0x199   : > { %2092 = vmatprep.subr.bf16.mxu0 %v4188_v51  ;;  %2133 = vmatprep.subr.bf16.mxu1 %v4191_v52  ;;  %v4246_v51 = vld [vmem:[#allocation7 + $0x1c0] ss:$16 sps:$4 sm:$0xff]   ;;  %v1174_v52 = vadd.f32 %v1163_v46, %v1148_v48  ;;  %v4303_v31 = vld [vmem:[#allocation7 + $0x2e8] ss:$16 sps:$4 sm:$0xff]   ;;  %v4326_v46 = vld [vmem:[#allocation7 + $0x16c] ss:$16 sps:$4 sm:$0xff]  }
 0x19a   : > { %2116 = vmatprep.mubr.bf16.mxu0 %v5067_v34  ;;  %2157 = vmatprep.mubr.bf16.mxu1 %v5071_v36  ;;  %v4318_v44 = vld [vmem:[#allocation7 + $0x148] ss:$16 sps:$4 sm:$0xff]  }
 0x19b   : > { %v4321_v45 = vld [vmem:[#allocation7 + $0x348] ss:$16 sps:$4 sm:$0xff]  }
 0x19c   : > { %2093 = vmatpush1.bf16.msra.mxu0 %v4186_v53  ;;  %2134 = vmatpush1.bf16.msra.mxu1 %v4189_v54  ;;  %v4249_v53 = vld [vmem:[#allocation7 + $0x3c0] ss:$16 sps:$4 sm:$0xff]   ;;  %v4254_v54 = vld [vmem:[#allocation7 + $0x1e4] ss:$16 sps:$4 sm:$0xff]   ;;  %v4324_v48 = vld [vmem:[#allocation7 + $0x168] ss:$16 sps:$4 sm:$0xff]  }
 0x19d   : > { %2094 = vmatprep.subr.bf16.mxu0 %v4194_v55  ;;  %2135 = vmatprep.subr.bf16.mxu1 %v4197_v56  ;;  %v4257_v55 = vld [vmem:[#allocation7 + $0x3e4] ss:$16 sps:$4 sm:$0xff]   ;;  %v1176_v56 = vmax.f32 %v1172_v50, 0.0  ;;  %v4332_v50 = vld [vmem:[#allocation7 + $0x18c] ss:$16 sps:$4 sm:$0xff]  }
 0x1a0   : > { %2095 = vmatpush1.bf16.msra.mxu0 %v4192_v57  ;;  %2136 = vmatpush1.bf16.msra.mxu1 %v4195_v58  ;;  %v4252_v57 = vld [vmem:[#allocation7 + $0x1e0] ss:$16 sps:$4 sm:$0xff]   ;;  %v1178_v58 = vmax.f32 %v1174_v52, 0.0  ;;  %v4330_v52 = vld [vmem:[#allocation7 + $0x188] ss:$16 sps:$4 sm:$0xff]  }
 0x1a1   : > { %2096 = vmatprep.subr.bf16.mxu0 %v4200_v59  ;;  %2137 = vmatprep.subr.bf16.mxu1 %v4203_v60  ;;  %v4255_v59 = vld [vmem:[#allocation7 + $0x3e0] ss:$16 sps:$4 sm:$0xff]   ;;  %v4260_v60 = vld [vmem:[#allocation7 + $0xc] ss:$16 sps:$4 sm:$0xff]  }
 0x1a4   : > { %2097 = vmatpush1.bf16.msra.mxu0 %v4198_v61  ;;  %2138 = vmatpush1.bf16.msra.mxu1 %v4201_v62  ;;  %v4263_v61 = vld [vmem:[#allocation7 + $0x20c] ss:$16 sps:$4 sm:$0xff]   ;;  %v5079_v62 = vpack.c.bf16 %v1176_v56, %v1176_v56  ;;  %v4336_v56 = vld [vmem:[#allocation7 + $0x1a8] ss:$16 sps:$4 sm:$0xff]  }
 0x1a5   : > { %2098 = vmatprep.subr.bf16.mxu0 %v4206_v63  ;;  %2139 = vmatprep.subr.bf16.mxu1 %v4209_v0  ;;  %v4258_v63 = vld [vmem:[#allocation7 + $0x8] ss:$16 sps:$4 sm:$0xff]   ;;  %v5081_v0 = vpack.c.bf16 %v1178_v58, %v1178_v58  ;;  %v4344_v58 = vld [vmem:[#allocation7 + $0x1cc] ss:$16 sps:$4 sm:$0xff]  }
 0x1a8   : > { %2099 = vmatpush1.bf16.msra.mxu0 %v4204_v1  ;;  %2140 = vmatpush1.bf16.msra.mxu1 %v4207_v2  ;;  %v4261_v1 = vld [vmem:[#allocation7 + $0x208] ss:$16 sps:$4 sm:$0xff]   ;;  %v4266_v2 = vld [vmem:[#allocation7 + $0x2c] ss:$16 sps:$4 sm:$0xff]  }
 0x1a9   : > { %2100 = vmatprep.subr.bf16.mxu0 %v4212_v3  ;;  %2141 = vmatprep.subr.bf16.mxu1 %v4215_v5  ;;  %v4269_v3 = vld [vmem:[#allocation7 + $0x22c] ss:$16 sps:$4 sm:$0xff]   ;;  %v4267_v5 = vld [vmem:[#allocation7 + $0x228] ss:$16 sps:$4 sm:$0xff]  }
 0x1ac   : > { %2101 = vmatpush1.bf16.msra.mxu0 %v4210_v6  ;;  %2142 = vmatpush1.bf16.msra.mxu1 %v4213_v7  ;;  %v4272_v6 = vld [vmem:[#allocation7 + $0x4c] ss:$16 sps:$4 sm:$0xff]  }
 0x1ad   : > { %2102 = vmatprep.subr.bf16.mxu0 %v4218_v8  ;;  %2143 = vmatprep.subr.bf16.mxu1 %v4221_v10  ;;  %v4275_v7 = vld [vmem:[#allocation7 + $0x24c] ss:$16 sps:$4 sm:$0xff]   ;;  %v4270_v8 = vld [vmem:[#allocation7 + $0x48] ss:$16 sps:$4 sm:$0xff]  }
 0x1ae   : > { %v4278_v10 = vld [vmem:[#allocation7 + $0x6c] ss:$16 sps:$4 sm:$0xff]  }
 0x1b0   : > { %2103 = vmatpush1.bf16.msra.mxu0 %v4216_v11  ;;  %2144 = vmatpush1.bf16.msra.mxu1 %v4219_v12  ;;  %v4281_v11 = vld [vmem:[#allocation7 + $0x26c] ss:$16 sps:$4 sm:$0xff]   ;;  %v4276_v12 = vld [vmem:[#allocation7 + $0x68] ss:$16 sps:$4 sm:$0xff]  }
 0x1b1   : > { %2104 = vmatprep.subr.bf16.mxu0 %v4224_v13  ;;  %2145 = vmatprep.subr.bf16.mxu1 %v4227_v16  ;;  %v4279_v13 = vld [vmem:[#allocation7 + $0x268] ss:$16 sps:$4 sm:$0xff]   ;;  %v4284_v16 = vld [vmem:[#allocation7 + $0x8c] ss:$16 sps:$4 sm:$0xff]  }
 0x1b4   : > { %2105 = vmatpush1.bf16.msra.mxu0 %v4222_v17  ;;  %2146 = vmatpush1.bf16.msra.mxu1 %v4225_v20  ;;  %v4287_v17 = vld [vmem:[#allocation7 + $0x28c] ss:$16 sps:$4 sm:$0xff]  }
 0x1b5   : > { %2106 = vmatprep.subr.bf16.mxu0 %v4230_v21  ;;  %2147 = vmatprep.subr.bf16.mxu1 %v4233_v24  ;;  %v4290_v20 = vld [vmem:[#allocation7 + $0xac] ss:$16 sps:$4 sm:$0xff]  }
 0x1b6   : > { %v4293_v21 = vld [vmem:[#allocation7 + $0x2ac] ss:$16 sps:$4 sm:$0xff]  }
 0x1b7   : > { %v4296_v24 = vld [vmem:[#allocation7 + $0xcc] ss:$16 sps:$4 sm:$0xff]  }
 0x1b8   : > { %2107 = vmatpush1.bf16.msra.mxu0 %v4228_v26  ;;  %2148 = vmatpush1.bf16.msra.mxu1 %v4231_v29  ;;  %v4294_v26 = vld [vmem:[#allocation7 + $0xc8] ss:$16 sps:$4 sm:$0xff]   ;;  %v4305_v29 = vld [vmem:[#allocation7 + $0x2ec] ss:$16 sps:$4 sm:$0xff]  }
 0x1b9   : > { %2108 = vmatprep.subr.bf16.mxu0 %v4236_v30  ;;  %2149 = vmatprep.subr.bf16.mxu1 %v4239_v33  ;;  %v4300_v30 = vld [vmem:[#allocation7 + $0xe8] ss:$16 sps:$4 sm:$0xff]   ;;  %v4311_v33 = vld [vmem:[#allocation7 + $0x30c] ss:$16 sps:$4 sm:$0xff]  }
 0x1bc   : > { %2109 = vmatpush1.bf16.msra.mxu0 %v4234_v37  ;;  %2150 = vmatpush1.bf16.msra.mxu1 %v4237_v39  ;;  %v4314_v37 = vld [vmem:[#allocation7 + $0x12c] ss:$16 sps:$4 sm:$0xff]  }
 0x1bd   : > { %2110 = vmatprep.subr.bf16.mxu0 %v4242_v40  ;;  %2151 = vmatprep.subr.bf16.mxu1 %v4245_v42  ;;  %v4317_v39 = vld [vmem:[#allocation7 + $0x32c] ss:$16 sps:$4 sm:$0xff]   ;;  %v4312_v40 = vld [vmem:[#allocation7 + $0x128] ss:$16 sps:$4 sm:$0xff]  }
 0x1be   : > { %v4320_v42 = vld [vmem:[#allocation7 + $0x14c] ss:$16 sps:$4 sm:$0xff]  }
 0x1c0   : > { %2111 = vmatpush1.bf16.msra.mxu0 %v4240_v41  ;;  %2152 = vmatpush1.bf16.msra.mxu1 %v4243_v43  ;;  %v4315_v41 = vld [vmem:[#allocation7 + $0x328] ss:$16 sps:$4 sm:$0xff]   ;;  %v4323_v43 = vld [vmem:[#allocation7 + $0x34c] ss:$16 sps:$4 sm:$0xff]  }
 0x1c1   : > { %2112 = vmatprep.subr.bf16.mxu0 %v4248_v47  ;;  %2153 = vmatprep.subr.bf16.mxu1 %v4251_v49  ;;  %v4329_v47 = vld [vmem:[#allocation7 + $0x36c] ss:$16 sps:$4 sm:$0xff]   ;;  %v4327_v49 = vld [vmem:[#allocation7 + $0x368] ss:$16 sps:$4 sm:$0xff]  }
 0x1c4   : > { %2113 = vmatpush1.bf16.msra.mxu0 %v4246_v51  ;;  %2154 = vmatpush1.bf16.msra.mxu1 %v4249_v53  ;;  %v4335_v51 = vld [vmem:[#allocation7 + $0x38c] ss:$16 sps:$4 sm:$0xff]   ;;  %v4333_v53 = vld [vmem:[#allocation7 + $0x388] ss:$16 sps:$4 sm:$0xff]  }
 0x1c5   : > { %2114 = vmatprep.subr.bf16.mxu0 %v4254_v54  ;;  %2155 = vmatprep.subr.bf16.mxu1 %v4257_v55  ;;  %v4338_v54 = vld [vmem:[#allocation7 + $0x1ac] ss:$16 sps:$4 sm:$0xff]  }
 0x1c6   : > { %v4341_v55 = vld [vmem:[#allocation7 + $0x3ac] ss:$16 sps:$4 sm:$0xff]  }
 0x1c8   : > { %2115 = vmatpush1.bf16.msra.mxu0 %v4252_v57  ;;  %2156 = vmatpush1.bf16.msra.mxu1 %v4255_v59  ;;  %v4339_v57 = vld [vmem:[#allocation7 + $0x3a8] ss:$16 sps:$4 sm:$0xff]   ;;  %v4347_v59 = vld [vmem:[#allocation7 + $0x3cc] ss:$16 sps:$4 sm:$0xff]  }
 0x1c9   : > { %2166 = vmatprep.subr.bf16.mxu0 %v4260_v60  ;;  %2207 = vmatprep.subr.bf16.mxu1 %v4263_v61  ;;  %v4342_v60 = vld [vmem:[#allocation7 + $0x1c8] ss:$16 sps:$4 sm:$0xff]  }
 0x1ca   : > { %v4345_v61 = vld [vmem:[#allocation7 + $0x3c8] ss:$16 sps:$4 sm:$0xff]  }
 0x1cb   : > { %2117 = vmatmul.mubr.bf16.vlgmr.msra.gmra.mrb[4].mxu0 %v5079_v62  ;;  %2158 = vmatmul.mubr.bf16.vlgmr.msra.gmra.mrb[4].mxu1 %v5081_v0 }
 0x1cc   : > { %2167 = vmatpush1.bf16.msra.mxu0 %v4258_v63  ;;  %2208 = vmatpush1.bf16.msra.mxu1 %v4261_v1  ;;  %v4350_v63 = vld [vmem:[#allocation7 + $0x1ec] ss:$16 sps:$4 sm:$0xff]  }
 0x1cd   : > { %2168 = vmatprep.subr.bf16.mxu0 %v4266_v2  ;;  %2209 = vmatprep.subr.bf16.mxu1 %v4269_v3  ;;  %v4353_v1 = vld [vmem:[#allocation7 + $0x3ec] ss:$16 sps:$4 sm:$0xff]   ;;  %v4348_v2 = vld [vmem:[#allocation7 + $0x1e8] ss:$16 sps:$4 sm:$0xff]  }
 0x1ce   : > { %2198 = vmatprep.mubr.bf16.mxu0 %v5067_v34  ;;  %2239 = vmatprep.mubr.bf16.mxu1 %v5071_v36  ;;  %v4306_v34 = vld [vmem:[#allocation7 + $0x108] ss:$16 sps:$4 sm:$0xff]  }
 0x1cf   : > { %v4309_v36 = vld [vmem:[#allocation7 + $0x308] ss:$16 sps:$4 sm:$0xff]  }
 0x1d0   : > { %2169 = vmatpush1.bf16.msra.mxu0 %v4264_v4  ;;  %2210 = vmatpush1.bf16.msra.mxu1 %v4267_v5  ;;  %v4351_v3 = vld [vmem:[#allocation7 + $0x3e8] ss:$16 sps:$4 sm:$0xff]   ;;  %v4356_v4 = vld [vmem:[#allocation5 + $0x4] ss:$16 sps:$4 sm:$0xff]  }
 0x1d1   : > { %2170 = vmatprep.subr.bf16.mxu0 %v4272_v6  ;;  %2211 = vmatprep.subr.bf16.mxu1 %v4275_v7  ;;  %v4359_v5 = vld [vmem:[#allocation5 + $0x204] ss:$16 sps:$4 sm:$0xff]   ;;  %v4354_v6 = vld [vmem:[#allocation5] ss:$16 sps:$4 sm:$0xff]  }
 0x1d2   : > { %v4357_v7 = vld [vmem:[#allocation5 + $0x200] ss:$16 sps:$4 sm:$0xff]  }
 0x1d4   : > { %2171 = vmatpush1.bf16.msra.mxu0 %v4270_v8  ;;  %2212 = vmatpush1.bf16.msra.mxu1 %v4273_v9  ;;  %v4362_v8 = vld [vmem:[#allocation5 + $0x24] ss:$16 sps:$4 sm:$0xff]  }
 0x1d5   : > { %2172 = vmatprep.subr.bf16.mxu0 %v4278_v10  ;;  %2213 = vmatprep.subr.bf16.mxu1 %v4281_v11  ;;  %v4365_v9 = vld [vmem:[#allocation5 + $0x224] ss:$16 sps:$4 sm:$0xff]   ;;  %v4360_v10 = vld [vmem:[#allocation5 + $0x20] ss:$16 sps:$4 sm:$0xff]  }
 0x1d6   : > { %v4363_v11 = vld [vmem:[#allocation5 + $0x220] ss:$16 sps:$4 sm:$0xff]  }
 0x1d8   : > { %2173 = vmatpush1.bf16.msra.mxu0 %v4276_v12  ;;  %2214 = vmatpush1.bf16.msra.mxu1 %v4279_v13  ;;  %v4368_v12 = vld [vmem:[#allocation5 + $0x44] ss:$16 sps:$4 sm:$0xff]  }
 0x1d9   : > { %2174 = vmatprep.subr.bf16.mxu0 %v4284_v16  ;;  %2215 = vmatprep.subr.bf16.mxu1 %v4287_v17  ;;  %v4371_v13 = vld [vmem:[#allocation5 + $0x244] ss:$16 sps:$4 sm:$0xff]   ;;  %v4366_v16 = vld [vmem:[#allocation5 + $0x40] ss:$16 sps:$4 sm:$0xff]  }
 0x1da   : > { %v4369_v17 = vld [vmem:[#allocation5 + $0x240] ss:$16 sps:$4 sm:$0xff]  }
 0x1dc   : > { %2175 = vmatpush1.bf16.msra.mxu0 %v4282_v18  ;;  %2216 = vmatpush1.bf16.msra.mxu1 %v4285_v19  ;;  %v4374_v18 = vld [vmem:[#allocation5 + $0x64] ss:$16 sps:$4 sm:$0xff]  }
 0x1dd   : > { %2176 = vmatprep.subr.bf16.mxu0 %v4290_v20  ;;  %2217 = vmatprep.subr.bf16.mxu1 %v4293_v21  ;;  %v4377_v19 = vld [vmem:[#allocation5 + $0x264] ss:$16 sps:$4 sm:$0xff]  }
 0x1de   : > { %v4380_v20 = vld [vmem:[#allocation5 + $0x84] ss:$16 sps:$4 sm:$0xff]  }
 0x1df   : > { %v4383_v21 = vld [vmem:[#allocation5 + $0x284] ss:$16 sps:$4 sm:$0xff]  }
 0x1e0   : > { %2177 = vmatpush1.bf16.msra.mxu0 %v4288_v22  ;;  %2218 = vmatpush1.bf16.msra.mxu1 %v4291_v23  ;;  %v4378_v22 = vld [vmem:[#allocation5 + $0x80] ss:$16 sps:$4 sm:$0xff]  }
 0x1e1   : > { %2178 = vmatprep.subr.bf16.mxu0 %v4296_v24  ;;  %2219 = vmatprep.subr.bf16.mxu1 %v4299_v25  ;;  %v4381_v23 = vld [vmem:[#allocation5 + $0x280] ss:$16 sps:$4 sm:$0xff]   ;;  %v4386_v24 = vld [vmem:[#allocation5 + $0xa4] ss:$16 sps:$4 sm:$0xff]  }
 0x1e2   : > { %v4389_v25 = vld [vmem:[#allocation5 + $0x2a4] ss:$16 sps:$4 sm:$0xff]  }
 0x1e4   : > { %2179 = vmatpush1.bf16.msra.mxu0 %v4294_v26  ;;  %2220 = vmatpush1.bf16.msra.mxu1 %v4297_v27  ;;  %v4384_v26 = vld [vmem:[#allocation5 + $0xa0] ss:$16 sps:$4 sm:$0xff]  }
 0x1e5   : > { %2180 = vmatprep.subr.bf16.mxu0 %v4302_v28  ;;  %2221 = vmatprep.subr.bf16.mxu1 %v4305_v29  ;;  %v4387_v27 = vld [vmem:[#allocation5 + $0x2a0] ss:$16 sps:$4 sm:$0xff]   ;;  %v4392_v28 = vld [vmem:[#allocation5 + $0xc4] ss:$16 sps:$4 sm:$0xff]  }
 0x1e6   : > { %v4395_v29 = vld [vmem:[#allocation5 + $0x2c4] ss:$16 sps:$4 sm:$0xff]  }
 0x1e8   : > { %2181 = vmatpush1.bf16.msra.mxu0 %v4300_v30  ;;  %2222 = vmatpush1.bf16.msra.mxu1 %v4303_v31  ;;  %v4390_v30 = vld [vmem:[#allocation5 + $0xc0] ss:$16 sps:$4 sm:$0xff]  }
 0x1e9   : > { %2182 = vmatprep.subr.bf16.mxu0 %v4308_v32  ;;  %2223 = vmatprep.subr.bf16.mxu1 %v4311_v33  ;;  %v4393_v31 = vld [vmem:[#allocation5 + $0x2c0] ss:$16 sps:$4 sm:$0xff]   ;;  %v4398_v32 = vld [vmem:[#allocation5 + $0xe4] ss:$16 sps:$4 sm:$0xff]  }
 0x1ea   : > { %v4401_v33 = vld [vmem:[#allocation5 + $0x2e4] ss:$16 sps:$4 sm:$0xff]  }
 0x1ec   : > { %2183 = vmatpush1.bf16.msra.mxu0 %v4306_v34  ;;  %2224 = vmatpush1.bf16.msra.mxu1 %v4309_v36  ;;  %v4396_v34 = vld [vmem:[#allocation5 + $0xe0] ss:$16 sps:$4 sm:$0xff]  }
 0x1ed   : > { %2184 = vmatprep.subr.bf16.mxu0 %v4314_v37  ;;  %2225 = vmatprep.subr.bf16.mxu1 %v4317_v39  ;;  %v4399_v36 = vld [vmem:[#allocation5 + $0x2e0] ss:$16 sps:$4 sm:$0xff]   ;;  %v4404_v37 = vld [vmem:[#allocation5 + $0x104] ss:$16 sps:$4 sm:$0xff]  }
 0x1ee   : > { %v4407_v39 = vld [vmem:[#allocation5 + $0x304] ss:$16 sps:$4 sm:$0xff]  }
 0x1f0   : > { %2185 = vmatpush1.bf16.msra.mxu0 %v4312_v40  ;;  %2226 = vmatpush1.bf16.msra.mxu1 %v4315_v41  ;;  %v4402_v40 = vld [vmem:[#allocation5 + $0x100] ss:$16 sps:$4 sm:$0xff]  }
 0x1f1   : > { %2186 = vmatprep.subr.bf16.mxu0 %v4320_v42  ;;  %2227 = vmatprep.subr.bf16.mxu1 %v4323_v43  ;;  %v4405_v41 = vld [vmem:[#allocation5 + $0x300] ss:$16 sps:$4 sm:$0xff]   ;;  %v4410_v42 = vld [vmem:[#allocation5 + $0x124] ss:$16 sps:$4 sm:$0xff]  }
 0x1f2   : > { %v4413_v43 = vld [vmem:[#allocation5 + $0x324] ss:$16 sps:$4 sm:$0xff]  }
 0x1f4   : > { %2187 = vmatpush1.bf16.msra.mxu0 %v4318_v44  ;;  %2228 = vmatpush1.bf16.msra.mxu1 %v4321_v45  ;;  %v4408_v44 = vld [vmem:[#allocation5 + $0x120] ss:$16 sps:$4 sm:$0xff]  }
 0x1f5   : > { %2188 = vmatprep.subr.bf16.mxu0 %v4326_v46  ;;  %2229 = vmatprep.subr.bf16.mxu1 %v4329_v47  ;;  %v4411_v45 = vld [vmem:[#allocation5 + $0x320] ss:$16 sps:$4 sm:$0xff]   ;;  %v4416_v46 = vld [vmem:[#allocation5 + $0x144] ss:$16 sps:$4 sm:$0xff]  }
 0x1f6   : > { %v4419_v47 = vld [vmem:[#allocation5 + $0x344] ss:$16 sps:$4 sm:$0xff]  }
 0x1f8   : > { %2189 = vmatpush1.bf16.msra.mxu0 %v4324_v48  ;;  %2230 = vmatpush1.bf16.msra.mxu1 %v4327_v49  ;;  %v4414_v48 = vld [vmem:[#allocation5 + $0x140] ss:$16 sps:$4 sm:$0xff]  }
 0x1f9   : > { %2190 = vmatprep.subr.bf16.mxu0 %v4332_v50  ;;  %2231 = vmatprep.subr.bf16.mxu1 %v4335_v51  ;;  %v4417_v49 = vld [vmem:[#allocation5 + $0x340] ss:$16 sps:$4 sm:$0xff]   ;;  %v4422_v50 = vld [vmem:[#allocation5 + $0x164] ss:$16 sps:$4 sm:$0xff]  }
 0x1fa   : > { %v4425_v51 = vld [vmem:[#allocation5 + $0x364] ss:$16 sps:$4 sm:$0xff]  }
 0x1fc   : > { %2191 = vmatpush1.bf16.msra.mxu0 %v4330_v52  ;;  %2232 = vmatpush1.bf16.msra.mxu1 %v4333_v53  ;;  %v4420_v52 = vld [vmem:[#allocation5 + $0x160] ss:$16 sps:$4 sm:$0xff]  }
 0x1fd   : > { %2192 = vmatprep.subr.bf16.mxu0 %v4338_v54  ;;  %2233 = vmatprep.subr.bf16.mxu1 %v4341_v55  ;;  %v4423_v53 = vld [vmem:[#allocation5 + $0x360] ss:$16 sps:$4 sm:$0xff]   ;;  %v4428_v54 = vld [vmem:[#allocation5 + $0x184] ss:$16 sps:$4 sm:$0xff]  }
 0x1fe   : > { %v4431_v55 = vld [vmem:[#allocation5 + $0x384] ss:$16 sps:$4 sm:$0xff]  }
 0x200   : > { %2193 = vmatpush1.bf16.msra.mxu0 %v4336_v56  ;;  %2234 = vmatpush1.bf16.msra.mxu1 %v4339_v57  ;;  %v4426_v56 = vld [vmem:[#allocation5 + $0x180] ss:$16 sps:$4 sm:$0xff]  }
 0x201   : > { %2194 = vmatprep.subr.bf16.mxu0 %v4344_v58  ;;  %2235 = vmatprep.subr.bf16.mxu1 %v4347_v59  ;;  %v4429_v57 = vld [vmem:[#allocation5 + $0x380] ss:$16 sps:$4 sm:$0xff]   ;;  %v4434_v58 = vld [vmem:[#allocation5 + $0x1a4] ss:$16 sps:$4 sm:$0xff]  }
 0x202   : > { %v4437_v59 = vld [vmem:[#allocation5 + $0x3a4] ss:$16 sps:$4 sm:$0xff]  }
 0x204   : > { %2195 = vmatpush1.bf16.msra.mxu0 %v4342_v60  ;;  %2236 = vmatpush1.bf16.msra.mxu1 %v4345_v61  ;;  %v4432_v60 = vld [vmem:[#allocation5 + $0x1a0] ss:$16 sps:$4 sm:$0xff]  }
 0x205   : > { %2196 = vmatprep.subr.bf16.mxu0 %v4350_v63  ;;  %2237 = vmatprep.subr.bf16.mxu1 %v4353_v1  ;;  %v4435_v61 = vld [vmem:[#allocation5 + $0x3a0] ss:$16 sps:$4 sm:$0xff]   ;;  %v4440_v63 = vld [vmem:[#allocation5 + $0x1c4] ss:$16 sps:$4 sm:$0xff]  }
 0x206   : > { %v4443_v1 = vld [vmem:[#allocation5 + $0x3c4] ss:$16 sps:$4 sm:$0xff]  }
 0x208   : > { %2197 = vmatpush1.bf16.msra.mxu0 %v4348_v2  ;;  %2238 = vmatpush1.bf16.msra.mxu1 %v4351_v3  ;;  %v4438_v2 = vld [vmem:[#allocation5 + $0x1c0] ss:$16 sps:$4 sm:$0xff]  }
 0x209   : > { %2888 = vmatprep.subr.bf16.mxu0 %v4356_v4  ;;  %2929 = vmatprep.subr.bf16.mxu1 %v4359_v5  ;;  %v4441_v3 = vld [vmem:[#allocation5 + $0x3c0] ss:$16 sps:$4 sm:$0xff]   ;;  %v4446_v4 = vld [vmem:[#allocation5 + $0x1e4] ss:$16 sps:$4 sm:$0xff]  }
 0x20a   : > { %v4449_v5 = vld [vmem:[#allocation5 + $0x3e4] ss:$16 sps:$4 sm:$0xff]  }
 0x20b   : > { %2199 = vmatmul.mubr.bf16.vlgmr.msra.gmra.mrb[8].mxu0 %v5079_v62  ;;  %2240 = vmatmul.mubr.bf16.vlgmr.msra.gmra.mrb[8].mxu1 %v5081_v0  ;;  %v4372_v62 = vld [vmem:[#allocation5 + $0x60] ss:$16 sps:$4 sm:$0xff]  }
 0x20c   : > { %2889 = vmatpush1.bf16.msra.mxu0 %v4354_v6  ;;  %2930 = vmatpush1.bf16.msra.mxu1 %v4357_v7  ;;  %v4375_v0 = vld [vmem:[#allocation5 + $0x260] ss:$16 sps:$4 sm:$0xff]  }
 0x20d   : > { %2890 = vmatprep.subr.bf16.mxu0 %v4362_v8  ;;  %2931 = vmatprep.subr.bf16.mxu1 %v4365_v9  ;;  %v4444_v6 = vld [vmem:[#allocation5 + $0x1e0] ss:$16 sps:$4 sm:$0xff]   ;;  %v4452_v8 = vld [vmem:[#allocation5 + $0xc] ss:$16 sps:$4 sm:$0xff]  }
 0x20e   : > { %v4447_v7 = vld [vmem:[#allocation5 + $0x3e0] ss:$16 sps:$4 sm:$0xff]   ;;  %v4455_v9 = vld [vmem:[#allocation5 + $0x20c] ss:$16 sps:$4 sm:$0xff]  }
 0x210   : > { %2891 = vmatpush1.bf16.msra.mxu0 %v4360_v10  ;;  %2932 = vmatpush1.bf16.msra.mxu1 %v4363_v11  ;;  %v1002_v10 = vld [vmem:[%s5240_s3] sm:$0xf] }
 0x211   : > { %2892 = vmatprep.subr.bf16.mxu0 %v4368_v12  ;;  %2933 = vmatprep.subr.bf16.mxu1 %v4371_v13  ;;  %v1007_v11 = vrot.slane %v1002_v10, %v5069_v35  ;;  %v1015_v12 = vrot.slane %v1002_v10, %v5073_v38  ;;  %v1011_v13 = vrot.slane %v1002_v10, %v5058_v14 }
 0x214   : > { %2893 = vmatpush1.bf16.msra.mxu0 %v4366_v16  ;;  %2934 = vmatpush1.bf16.msra.mxu1 %v4369_v17  ;;  %v1019_v16 = vrot.slane %v1002_v10, %v5060_v15  ;;  %v4509_v10 = vld [vmem:[#allocation5 + $0x32c] ss:$16 sps:$4 sm:$0xff]  }
 0x215   : > { %2894 = vmatprep.subr.bf16.mxu0 %v4374_v18  ;;  %2935 = vmatprep.subr.bf16.mxu1 %v4377_v19 }
 0x218   : > { %2895 = vmatpush1.bf16.msra.mxu0 %v4372_v62  ;;  %2936 = vmatpush1.bf16.msra.mxu1 %v4375_v0 }
 0x219   : > { %2896 = vmatprep.subr.bf16.mxu0 %v4380_v20  ;;  %2937 = vmatprep.subr.bf16.mxu1 %v4383_v21 }
 0x21c   : > { %2897 = vmatpush1.bf16.msra.mxu0 %v4378_v22  ;;  %2938 = vmatpush1.bf16.msra.mxu1 %v4381_v23 }
 0x21d   : > { %2898 = vmatprep.subr.bf16.mxu0 %v4386_v24  ;;  %2939 = vmatprep.subr.bf16.mxu1 %v4389_v25 }
 0x220   : > { %2899 = vmatpush1.bf16.msra.mxu0 %v4384_v26  ;;  %2940 = vmatpush1.bf16.msra.mxu1 %v4387_v27 }
 0x221   : > { %2900 = vmatprep.subr.bf16.mxu0 %v4392_v28  ;;  %2941 = vmatprep.subr.bf16.mxu1 %v4395_v29 }
 0x224   : > { %2901 = vmatpush1.bf16.msra.mxu0 %v4390_v30  ;;  %2942 = vmatpush1.bf16.msra.mxu1 %v4393_v31 }
 0x225   : > { %2902 = vmatprep.subr.bf16.mxu0 %v4398_v32  ;;  %2943 = vmatprep.subr.bf16.mxu1 %v4401_v33  ;;  %v4450_v33 = vld [vmem:[#allocation5 + $0x8] ss:$16 sps:$4 sm:$0xff]  }
 0x228   : > { %2903 = vmatpush1.bf16.msra.mxu0 %v4396_v34  ;;  %2944 = vmatpush1.bf16.msra.mxu1 %v4399_v36 }
 0x229   : > { %2904 = vmatprep.subr.bf16.mxu0 %v4404_v37  ;;  %2945 = vmatprep.subr.bf16.mxu1 %v4407_v39  ;;  %v4453_v37 = vld [vmem:[#allocation5 + $0x208] ss:$16 sps:$4 sm:$0xff]   ;;  %v4458_v39 = vld [vmem:[#allocation5 + $0x2c] ss:$16 sps:$4 sm:$0xff]  }
 0x22c   : > { %2905 = vmatpush1.bf16.msra.mxu0 %v4402_v40  ;;  %2946 = vmatpush1.bf16.msra.mxu1 %v4405_v41  ;;  %v4461_v40 = vld [vmem:[#allocation5 + $0x22c] ss:$16 sps:$4 sm:$0xff]   ;;  %v4456_v41 = vld [vmem:[#allocation5 + $0x28] ss:$16 sps:$4 sm:$0xff]  }
 0x22d   : > { %2906 = vmatprep.subr.bf16.mxu0 %v4410_v42  ;;  %2947 = vmatprep.subr.bf16.mxu1 %v4413_v43  ;;  %v4459_v42 = vld [vmem:[#allocation5 + $0x228] ss:$16 sps:$4 sm:$0xff]   ;;  %v4464_v43 = vld [vmem:[#allocation5 + $0x4c] ss:$16 sps:$4 sm:$0xff]  }
 0x230   : > { %2907 = vmatpush1.bf16.msra.mxu0 %v4408_v44  ;;  %2948 = vmatpush1.bf16.msra.mxu1 %v4411_v45  ;;  %v4467_v44 = vld [vmem:[#allocation5 + $0x24c] ss:$16 sps:$4 sm:$0xff]   ;;  %v4462_v45 = vld [vmem:[#allocation5 + $0x48] ss:$16 sps:$4 sm:$0xff]  }
 0x231   : > { %2908 = vmatprep.subr.bf16.mxu0 %v4416_v46  ;;  %2949 = vmatprep.subr.bf16.mxu1 %v4419_v47  ;;  %v4465_v46 = vld [vmem:[#allocation5 + $0x248] ss:$16 sps:$4 sm:$0xff]   ;;  %v4470_v47 = vld [vmem:[#allocation5 + $0x6c] ss:$16 sps:$4 sm:$0xff]  }
 0x234   : > { %2909 = vmatpush1.bf16.msra.mxu0 %v4414_v48  ;;  %2950 = vmatpush1.bf16.msra.mxu1 %v4417_v49  ;;  %v4473_v48 = vld [vmem:[#allocation5 + $0x26c] ss:$16 sps:$4 sm:$0xff]   ;;  %v4468_v49 = vld [vmem:[#allocation5 + $0x68] ss:$16 sps:$4 sm:$0xff]  }
 0x235   : > { %2910 = vmatprep.subr.bf16.mxu0 %v4422_v50  ;;  %2951 = vmatprep.subr.bf16.mxu1 %v4425_v51  ;;  %v4471_v50 = vld [vmem:[#allocation5 + $0x268] ss:$16 sps:$4 sm:$0xff]   ;;  %v4476_v51 = vld [vmem:[#allocation5 + $0x8c] ss:$16 sps:$4 sm:$0xff]  }
 0x238   : > { %2911 = vmatpush1.bf16.msra.mxu0 %v4420_v52  ;;  %2952 = vmatpush1.bf16.msra.mxu1 %v4423_v53  ;;  %v4479_v52 = vld [vmem:[#allocation5 + $0x28c] ss:$16 sps:$4 sm:$0xff]   ;;  %v4474_v53 = vld [vmem:[#allocation5 + $0x88] ss:$16 sps:$4 sm:$0xff]  }
 0x239   : > { %2912 = vmatprep.subr.bf16.mxu0 %v4428_v54  ;;  %2953 = vmatprep.subr.bf16.mxu1 %v4431_v55  ;;  %v4477_v54 = vld [vmem:[#allocation5 + $0x288] ss:$16 sps:$4 sm:$0xff]   ;;  %v4482_v55 = vld [vmem:[#allocation5 + $0xac] ss:$16 sps:$4 sm:$0xff]  }
 0x23c   : > { %2913 = vmatpush1.bf16.msra.mxu0 %v4426_v56  ;;  %2954 = vmatpush1.bf16.msra.mxu1 %v4429_v57  ;;  %v4485_v56 = vld [vmem:[#allocation5 + $0x2ac] ss:$16 sps:$4 sm:$0xff]   ;;  %v4480_v57 = vld [vmem:[#allocation5 + $0xa8] ss:$16 sps:$4 sm:$0xff]  }
 0x23d   : > { %2914 = vmatprep.subr.bf16.mxu0 %v4434_v58  ;;  %2955 = vmatprep.subr.bf16.mxu1 %v4437_v59  ;;  %v4483_v58 = vld [vmem:[#allocation5 + $0x2a8] ss:$16 sps:$4 sm:$0xff]   ;;  %v4488_v59 = vld [vmem:[#allocation5 + $0xcc] ss:$16 sps:$4 sm:$0xff]  }
 0x240   : > { %2915 = vmatpush1.bf16.msra.mxu0 %v4432_v60  ;;  %2956 = vmatpush1.bf16.msra.mxu1 %v4435_v61  ;;  %v4491_v60 = vld [vmem:[#allocation5 + $0x2cc] ss:$16 sps:$4 sm:$0xff]   ;;  %v4486_v61 = vld [vmem:[#allocation5 + $0xc8] ss:$16 sps:$4 sm:$0xff]  }
 0x241   : > { %2916 = vmatprep.subr.bf16.mxu0 %v4440_v63  ;;  %2957 = vmatprep.subr.bf16.mxu1 %v4443_v1  ;;  %v4489_v63 = vld [vmem:[#allocation5 + $0x2c8] ss:$16 sps:$4 sm:$0xff]   ;;  %v4494_v1 = vld [vmem:[#allocation5 + $0xec] ss:$16 sps:$4 sm:$0xff]  }
 0x244   : > { %2917 = vmatpush1.bf16.msra.mxu0 %v4438_v2  ;;  %2958 = vmatpush1.bf16.msra.mxu1 %v4441_v3  ;;  %v4497_v2 = vld [vmem:[#allocation5 + $0x2ec] ss:$16 sps:$4 sm:$0xff]   ;;  %v4492_v3 = vld [vmem:[#allocation5 + $0xe8] ss:$16 sps:$4 sm:$0xff]  }
 0x245   : > { %2918 = vmatprep.subr.bf16.mxu0 %v4446_v4  ;;  %2959 = vmatprep.subr.bf16.mxu1 %v4449_v5  ;;  %v4495_v4 = vld [vmem:[#allocation5 + $0x2e8] ss:$16 sps:$4 sm:$0xff]   ;;  %v4500_v5 = vld [vmem:[#allocation5 + $0x10c] ss:$16 sps:$4 sm:$0xff]  }
 0x248   : > { %2919 = vmatpush1.bf16.msra.mxu0 %v4444_v6  ;;  %2960 = vmatpush1.bf16.msra.mxu1 %v4447_v7  ;;  %v4503_v6 = vld [vmem:[#allocation5 + $0x30c] ss:$16 sps:$4 sm:$0xff]   ;;  %v4498_v7 = vld [vmem:[#allocation5 + $0x108] ss:$16 sps:$4 sm:$0xff]  }
 0x249   : > { %2970 = vmatprep.subr.bf16.mxu0 %v4452_v8  ;;  %3011 = vmatprep.subr.bf16.mxu1 %v4455_v9  ;;  %v4501_v8 = vld [vmem:[#allocation5 + $0x308] ss:$16 sps:$4 sm:$0xff]   ;;  %v4506_v9 = vld [vmem:[#allocation5 + $0x12c] ss:$16 sps:$4 sm:$0xff]  }
 0x25e   : > { %v1094_v17 = vpop.f32.mrb[0].mxu0  ;;  %v1135_v19 = vpop.f32.mrb[0].mxu1 }
 0x25f   : > { %v1095_v18 = vadd.f32 %v1094_v17, %v1007_v11  ;;  %v1096_v62 = vpop.f32.mrb[1].mxu0  ;;  %v1136_v0 = vadd.f32 %v1135_v19, %v1015_v12  ;;  %v1137_v21 = vpop.f32.mrb[1].mxu1  ;;  %v4504_v11 = vld [vmem:[#allocation5 + $0x128] ss:$16 sps:$4 sm:$0xff]   ;;  %v4518_v19 = vld [vmem:[#allocation5 + $0x16c] ss:$16 sps:$4 sm:$0xff]  }
 0x260   : > { %v1097_v20 = vadd.f32 %v1096_v62, %v1011_v13  ;;  %v1098_v22 = vpop.f32.mrb[2].mxu0  ;;  %v1138_v24 = vadd.f32 %v1137_v21, %v1019_v16  ;;  %v1139_v25 = vpop.f32.mrb[2].mxu1  ;;  %v4507_v12 = vld [vmem:[#allocation5 + $0x328] ss:$16 sps:$4 sm:$0xff]   ;;  %v4512_v13 = vld [vmem:[#allocation5 + $0x14c] ss:$16 sps:$4 sm:$0xff]  }
 0x261   : > { %v1142_v23 = vmax.f32 %v1095_v18, 0.0  ;;  %v1099_v26 = vpop.f32.mrb[3].mxu0  ;;  %v1144_v27 = vmax.f32 %v1136_v0, 0.0  ;;  %v1140_v29 = vpop.f32.mrb[3].mxu1  ;;  %v4515_v16 = vld [vmem:[#allocation5 + $0x34c] ss:$16 sps:$4 sm:$0xff]  }
 0x262   : > { %v1143_v28 = vmax.f32 %v1097_v20, 0.0  ;;  %v1145_v30 = vmax.f32 %v1138_v24, 0.0  ;;  %v4510_v17 = vld [vmem:[#allocation5 + $0x148] ss:$16 sps:$4 sm:$0xff]   ;;  %v4521_v62 = vld [vmem:[#allocation5 + $0x36c] ss:$16 sps:$4 sm:$0xff]  }
 0x263   : > { %v5096_v31 = vpack.c.bf16 %v1144_v27, %v1144_v27  ;;  %v5098_v34 = vpack.c.bf16 %v1142_v23, %v1142_v23  ;;  %v4513_v18 = vld [vmem:[#allocation5 + $0x348] ss:$16 sps:$4 sm:$0xff]   ;;  %v4524_v21 = vld [vmem:[#allocation5 + $0x18c] ss:$16 sps:$4 sm:$0xff]  }
 0x264   : > { %v1181_v32 = vpack.c.bf16 %v1143_v28, %v1143_v28  ;;  %v1183_v36 = vpack.c.bf16 %v1145_v30, %v1145_v30  ;;  %v4516_v0 = vld [vmem:[#allocation5 + $0x168] ss:$16 sps:$4 sm:$0xff]   ;;  %v4527_v22 = vld [vmem:[#allocation5 + $0x38c] ss:$16 sps:$4 sm:$0xff]  }
 0x265   : > { %v4519_v20 = vld [vmem:[#allocation5 + $0x368] ss:$16 sps:$4 sm:$0xff]   ;;  %v4530_v25 = vld [vmem:[#allocation5 + $0x1ac] ss:$16 sps:$4 sm:$0xff]  }
 0x266   : > { %2920 = vmatprep.mubr.bf16.mxu0 %v1181_v32  ;;  %2961 = vmatprep.mubr.bf16.mxu1 %v1183_v36  ;;  %v4522_v23 = vld [vmem:[#allocation5 + $0x188] ss:$16 sps:$4 sm:$0xff]   ;;  %v4533_v26 = vld [vmem:[#allocation5 + $0x3ac] ss:$16 sps:$4 sm:$0xff]  }
 0x267   : > { %2921 = vmatmul.mubr.bf16.vlgmr.msra.gmra.mrb[12].mxu0 %v5098_v34  ;;  %2962 = vmatmul.mubr.bf16.vlgmr.msra.gmra.mrb[12].mxu1 %v5096_v31  ;;  %v4525_v24 = vld [vmem:[#allocation5 + $0x388] ss:$16 sps:$4 sm:$0xff]   ;;  %v4536_v29 = vld [vmem:[#allocation5 + $0x1cc] ss:$16 sps:$4 sm:$0xff]  }
 0x268   : > { %2971 = vmatpush1.bf16.msra.mxu0 %v4450_v33  ;;  %3012 = vmatpush1.bf16.msra.mxu1 %v4453_v37  ;;  %v4528_v27 = vld [vmem:[#allocation5 + $0x1a8] ss:$16 sps:$4 sm:$0xff]   ;;  %v4539_v30 = vld [vmem:[#allocation5 + $0x3cc] ss:$16 sps:$4 sm:$0xff]  }
 0x269   : > { %3002 = vmatprep.mubr.bf16.mxu0 %v1181_v32  ;;  %3043 = vmatprep.mubr.bf16.mxu1 %v1183_v36  ;;  %v4531_v28 = vld [vmem:[#allocation5 + $0x3a8] ss:$16 sps:$4 sm:$0xff]   ;;  %v4542_v36 = vld [vmem:[#allocation5 + $0x1ec] ss:$16 sps:$4 sm:$0xff]  }
 0x26a   : > { %2972 = vmatprep.subr.bf16.mxu0 %v4458_v39  ;;  %3013 = vmatprep.subr.bf16.mxu1 %v4461_v40  ;;  %v4534_v32 = vld [vmem:[#allocation5 + $0x1c8] ss:$16 sps:$4 sm:$0xff]   ;;  %v4545_v37 = vld [vmem:[#allocation5 + $0x3ec] ss:$16 sps:$4 sm:$0xff]  }
 0x26b   : > { %v4537_v33 = vld [vmem:[#allocation5 + $0x3c8] ss:$16 sps:$4 sm:$0xff]  }
 0x26c   : > { %2973 = vmatpush1.bf16.msra.mxu0 %v4456_v41  ;;  %3014 = vmatpush1.bf16.msra.mxu1 %v4459_v42  ;;  %v4540_v42 = vld [vmem:[#allocation5 + $0x1e8] ss:$16 sps:$4 sm:$0xff]  }
 0x26d   : > { %2974 = vmatprep.subr.bf16.mxu0 %v4464_v43  ;;  %3015 = vmatprep.subr.bf16.mxu1 %v4467_v44 }
 0x270   : > { %2975 = vmatpush1.bf16.msra.mxu0 %v4462_v45  ;;  %3016 = vmatpush1.bf16.msra.mxu1 %v4465_v46  ;;  %v4543_v46 = vld [vmem:[#allocation5 + $0x3e8] ss:$16 sps:$4 sm:$0xff]  }
 0x271   : > { %2976 = vmatprep.subr.bf16.mxu0 %v4470_v47  ;;  %3017 = vmatprep.subr.bf16.mxu1 %v4473_v48 }
 0x274   : > { %2977 = vmatpush1.bf16.msra.mxu0 %v4468_v49  ;;  %3018 = vmatpush1.bf16.msra.mxu1 %v4471_v50  ;;  %v4546_v50 = vld [vmem:[%s5246_s9 + $0x40] sm:$0xff]  }
 0x275   : > { %2978 = vmatprep.subr.bf16.mxu0 %v4476_v51  ;;  %3019 = vmatprep.subr.bf16.mxu1 %v4479_v52  ;;  %v4547_v52 = vld [vmem:[%s5246_s9] sm:$0xff]  }
 0x278   : > { %2979 = vmatpush1.bf16.msra.mxu0 %v4474_v53  ;;  %3020 = vmatpush1.bf16.msra.mxu1 %v4477_v54  ;;  %v4548_v53 = vld [vmem:[%s5246_s9 + $0x48] sm:$0xff]  }
 0x279   : > { %2980 = vmatprep.subr.bf16.mxu0 %v4482_v55  ;;  %3021 = vmatprep.subr.bf16.mxu1 %v4485_v56  ;;  %v4549_v54 = vld [vmem:[%s5246_s9 + $0x8] sm:$0xff]   ;;  %v4550_v55 = vld [vmem:[%s5246_s9 + $0x50] sm:$0xff]  }
 0x27a   : > { %v4551_v56 = vld [vmem:[%s5246_s9 + $0x10] sm:$0xff]  }
 0x27c   : > { %2981 = vmatpush1.bf16.msra.mxu0 %v4480_v57  ;;  %3022 = vmatpush1.bf16.msra.mxu1 %v4483_v58  ;;  %v4554_v57 = vld [vmem:[%s5246_s9 + $0x60] sm:$0xff]  }
 0x27d   : > { %2982 = vmatprep.subr.bf16.mxu0 %v4488_v59  ;;  %3023 = vmatprep.subr.bf16.mxu1 %v4491_v60  ;;  %v4555_v58 = vld [vmem:[%s5246_s9 + $0x20] sm:$0xff]   ;;  %v4556_v59 = vld [vmem:[%s5246_s9 + $0x68] sm:$0xff]  }
 0x27e   : > { %v4557_v60 = vld [vmem:[%s5246_s9 + $0x28] sm:$0xff]  }
 0x280   : > { %2983 = vmatpush1.bf16.msra.mxu0 %v4486_v61  ;;  %3024 = vmatpush1.bf16.msra.mxu1 %v4489_v63  ;;  %v4558_v61 = vld [vmem:[%s5246_s9 + $0x70] sm:$0xff]  }
 0x281   : > { %2984 = vmatprep.subr.bf16.mxu0 %v4494_v1  ;;  %3025 = vmatprep.subr.bf16.mxu1 %v4497_v2  ;;  %v4559_v63 = vld [vmem:[%s5246_s9 + $0x30] sm:$0xff]   ;;  %v4560_v1 = vld [vmem:[%s5246_s9 + $0x78] sm:$0xff]  }
 0x282   : > { %v4561_v2 = vld [vmem:[%s5246_s9 + $0x38] sm:$0xff]  }
 0x284   : > { %2985 = vmatpush1.bf16.msra.mxu0 %v4492_v3  ;;  %3026 = vmatpush1.bf16.msra.mxu1 %v4495_v4  ;;  %v4562_v3 = vld [vmem:[%s5246_s9 + $0xc0] sm:$0xff]  }
 0x285   : > { %2986 = vmatprep.subr.bf16.mxu0 %v4500_v5  ;;  %3027 = vmatprep.subr.bf16.mxu1 %v4503_v6  ;;  %v4563_v4 = vld [vmem:[%s5246_s9 + $0x80] sm:$0xff]   ;;  %v4564_v5 = vld [vmem:[%s5246_s9 + $0xc8] sm:$0xff]  }
 0x286   : > { %v4565_v6 = vld [vmem:[%s5246_s9 + $0x88] sm:$0xff]  }
 0x288   : > { %2987 = vmatpush1.bf16.msra.mxu0 %v4498_v7  ;;  %3028 = vmatpush1.bf16.msra.mxu1 %v4501_v8  ;;  %v4566_v7 = vld [vmem:[%s5246_s9 + $0xd0] sm:$0xff]  }
 0x289   : > { %2988 = vmatprep.subr.bf16.mxu0 %v4506_v9  ;;  %3029 = vmatprep.subr.bf16.mxu1 %v4509_v10  ;;  %v4567_v8 = vld [vmem:[%s5246_s9 + $0x90] sm:$0xff]   ;;  %v4568_v9 = vld [vmem:[%s5246_s9 + $0xd8] sm:$0xff]  }
 0x28a   : > { %v4569_v10 = vld [vmem:[%s5246_s9 + $0x98] sm:$0xff]  }
 0x28c   : > { %2989 = vmatpush1.bf16.msra.mxu0 %v4504_v11  ;;  %3030 = vmatpush1.bf16.msra.mxu1 %v4507_v12  ;;  %v4570_v11 = vld [vmem:[%s5246_s9 + $0xe0] sm:$0xff]  }
 0x28d   : > { %2990 = vmatprep.subr.bf16.mxu0 %v4512_v13  ;;  %3031 = vmatprep.subr.bf16.mxu1 %v4515_v16  ;;  %v4571_v12 = vld [vmem:[%s5246_s9 + $0xa0] sm:$0xff]  }
 0x290   : > { %2991 = vmatpush1.bf16.msra.mxu0 %v4510_v17  ;;  %3032 = vmatpush1.bf16.msra.mxu1 %v4513_v18 }
 0x291   : > { %2992 = vmatprep.subr.bf16.mxu0 %v4518_v19  ;;  %3033 = vmatprep.subr.bf16.mxu1 %v4521_v62 }
 0x294   : > { %2993 = vmatpush1.bf16.msra.mxu0 %v4516_v0  ;;  %3034 = vmatpush1.bf16.msra.mxu1 %v4519_v20 }
 0x295   : > { %2994 = vmatprep.subr.bf16.mxu0 %v4524_v21  ;;  %3035 = vmatprep.subr.bf16.mxu1 %v4527_v22 }
 0x298   : > { %2995 = vmatpush1.bf16.msra.mxu0 %v4522_v23  ;;  %3036 = vmatpush1.bf16.msra.mxu1 %v4525_v24  ;;  %v4572_v23 = vld [vmem:[%s5246_s9 + $0xe8] sm:$0xff]  }
 0x299   : > { %2996 = vmatprep.subr.bf16.mxu0 %v4530_v25  ;;  %3037 = vmatprep.subr.bf16.mxu1 %v4533_v26  ;;  %v4573_v24 = vld [vmem:[%s5246_s9 + $0xa8] sm:$0xff]   ;;  %v4574_v25 = vld [vmem:[%s5246_s9 + $0xf0] sm:$0xff]  }
 0x29a   : > { %v4575_v26 = vld [vmem:[%s5246_s9 + $0xb0] sm:$0xff]  }
 0x29c   : > { %2997 = vmatpush1.bf16.msra.mxu0 %v4528_v27  ;;  %3038 = vmatpush1.bf16.msra.mxu1 %v4531_v28  ;;  %v4576_v27 = vld [vmem:[%s5246_s9 + $0xf8] sm:$0xff]  }
 0x29d   : > { %2998 = vmatprep.subr.bf16.mxu0 %v4536_v29  ;;  %3039 = vmatprep.subr.bf16.mxu1 %v4539_v30  ;;  %v4577_v28 = vld [vmem:[%s5246_s9 + $0xb8] sm:$0xff]   ;;  %v3052_v29 = vld [vmem:[%s5266_s24] sm:$0xf] }
 0x29e   : > { %v2118_v39 = vpop.f32.mrb[4].mxu0  ;;  %v2159_v41 = vpop.f32.mrb[4].mxu1 }
 0x29f   : > { %v2120_v40 = vpop.f32.mrb[5].mxu0  ;;  %v5102_v44 = vadd.f32 %v2159_v41, %v2118_v39  ;;  %v2161_v45 = vpop.f32.mrb[5].mxu1  ;;  %v3061_v41 = vrot.slane %v3052_v29, %v5058_v14 }
 0x2a0   : > { %2999 = vmatpush1.bf16.msra.mxu0 %v4534_v32  ;;  %v2122_v43 = vpop.f32.mrb[6].mxu0  ;;  %3040 = vmatpush1.bf16.msra.mxu1 %v4537_v33  ;;  %v5104_v48 = vadd.f32 %v2161_v45, %v2120_v40  ;;  %v2163_v49 = vpop.f32.mrb[6].mxu1 }
 0x2a1   : > { %3000 = vmatprep.subr.bf16.mxu0 %v4542_v36  ;;  %v2123_v47 = vpop.f32.mrb[7].mxu0  ;;  %3041 = vmatprep.subr.bf16.mxu1 %v4545_v37  ;;  %v2164_v51 = vpop.f32.mrb[7].mxu1  ;;  %v3057_v36 = vrot.slane %v3052_v29, %v5069_v35 }
 0x2a4   : > { %3001 = vmatpush1.bf16.msra.mxu0 %v4540_v42  ;;  %3042 = vmatpush1.bf16.msra.mxu1 %v4543_v46 }
 0x2a5   : > { %3935 = vmatprep.subr.bf16.mxu0 %v4546_v50  ;;  %3957 = vmatprep.subr.bf16.mxu1 %v4562_v3 }
 0x2a7   : > { %3003 = vmatmul.mubr.bf16.vlgmr.msra.gmra.mrb[16].mxu0 %v5098_v34  ;;  %3044 = vmatmul.mubr.bf16.vlgmr.msra.gmra.mrb[16].mxu1 %v5096_v31  ;;  %v4552_v31 = vld [vmem:[%s5246_s9 + $0x58] sm:$0xff]  }
 0x2a8   : > { %3936 = vmatpush3.bf16.msra.mxu0 %v4547_v52  ;;  %v4553_v34 = vld [vmem:[%s5246_s9 + $0x18] sm:$0xff]   ;;  %3958 = vmatpush3.bf16.msra.mxu1 %v4563_v4 }
 0x2a9   : > { %3937 = vmatprep.subr.bf16.mxu0 %v4548_v53  ;;  %3959 = vmatprep.subr.bf16.mxu1 %v4564_v5 }
 0x2ac   : > { %3938 = vmatpush3.bf16.msra.mxu0 %v4549_v54  ;;  %3960 = vmatpush3.bf16.msra.mxu1 %v4565_v6 }
 0x2ad   : > { %3939 = vmatprep.subr.bf16.mxu0 %v4550_v55  ;;  %3961 = vmatprep.subr.bf16.mxu1 %v4566_v7 }
 0x2b0   : > { %3940 = vmatpush3.bf16.msra.mxu0 %v4551_v56  ;;  %3962 = vmatpush3.bf16.msra.mxu1 %v4567_v8  ;;  %v3065_v56 = vrot.slane %v3052_v29, %v5073_v38 }
 0x2b1   : > { %3941 = vmatprep.subr.bf16.mxu0 %v4552_v31  ;;  %3963 = vmatprep.subr.bf16.mxu1 %v4568_v9 }
 0x2b4   : > { %3942 = vmatpush3.bf16.msra.mxu0 %v4553_v34  ;;  %3964 = vmatpush3.bf16.msra.mxu1 %v4569_v10 }
 0x2b5   : > { %3943 = vmatprep.subr.bf16.mxu0 %v4554_v57  ;;  %3965 = vmatprep.subr.bf16.mxu1 %v4570_v11  ;;  %v3069_v57 = vrot.slane %v3052_v29, %v5060_v15  ;;  %v3897_v15 = vld [vmem:[%s5267_s23] ss:$0 sm:$0xff] }
 0x2b8   : > { %3944 = vmatpush3.bf16.msra.mxu0 %v4555_v58  ;;  %3966 = vmatpush3.bf16.msra.mxu1 %v4571_v12 }
 0x2b9   : > { %3945 = vmatprep.subr.bf16.mxu0 %v4556_v59  ;;  %3967 = vmatprep.subr.bf16.mxu1 %v4572_v23 }
 0x2bc   : > { %3946 = vmatpush3.bf16.msra.mxu0 %v4557_v60  ;;  %3968 = vmatpush3.bf16.msra.mxu1 %v4573_v24 }
 0x2bd   : > { %3947 = vmatprep.subr.bf16.mxu0 %v4558_v61  ;;  %3969 = vmatprep.subr.bf16.mxu1 %v4574_v25 }
 0x2c0   : > { %3948 = vmatpush3.bf16.msra.mxu0 %v4559_v63  ;;  %3970 = vmatpush3.bf16.msra.mxu1 %v4575_v26 }
 0x2c1   : > { %3949 = vmatprep.subr.bf16.mxu0 %v4560_v1  ;;  %3971 = vmatprep.subr.bf16.mxu1 %v4576_v27 }
 0x2c4   : > { %3950 = vmatpush3.bf16.msra.mxu0 %v4561_v2  ;;  %3972 = vmatpush3.bf16.msra.mxu1 %v4577_v28 }
 0x2de   : > { %v2200_v13 = vpop.f32.mrb[8].mxu0  ;;  %v2241_v17 = vpop.f32.mrb[8].mxu1 }
 0x2df   : > { %v2202_v16 = vpop.f32.mrb[9].mxu0  ;;  %v2242_v19 = vadd.f32 %v2241_v17, %v2200_v13  ;;  %v2243_v62 = vpop.f32.mrb[9].mxu1 }
 0x2e0   : > { %v2204_v18 = vpop.f32.mrb[10].mxu0  ;;  %v2244_v20 = vadd.f32 %v2243_v62, %v2202_v16  ;;  %v2245_v21 = vpop.f32.mrb[10].mxu1 }
 0x2e1   : > { %v2205_v0 = vpop.f32.mrb[11].mxu0  ;;  %v2246_v22 = vpop.f32.mrb[11].mxu1 }
 0x33a   : > { %v2922_v30 = vpop.f32.mrb[12].mxu0  ;;  %v2963_v33 = vpop.f32.mrb[12].mxu1 }
 0x33b   : > { %v2923_v32 = vadd.f32 %v2922_v30, %v5102_v44  ;;  %v2924_v37 = vpop.f32.mrb[13].mxu0  ;;  %v2965_v40 = vpop.f32.mrb[13].mxu1 }
 0x33c   : > { %v2925_v39 = vadd.f32 %v2924_v37, %v5104_v48  ;;  %v2926_v42 = vpop.f32.mrb[14].mxu0  ;;  %v2967_v45 = vpop.f32.mrb[14].mxu1 }
 0x33d   : > { %v2964_v43 = vadd.f32 %v2963_v33, %v2923_v32  ;;  %v2927_v46 = vpop.f32.mrb[15].mxu0  ;;  %v2968_v49 = vpop.f32.mrb[15].mxu1 }
 0x33e   : > { %v2966_v47 = vadd.f32 %v2965_v40, %v2925_v39 }
 0x33f   : > { %v3074_v50 = vadd.f32 %v3057_v36, %v2964_v43 }
 0x340   : > { %v3075_v51 = vadd.f32 %v3061_v41, %v2966_v47 }
 0x341   : > { %v3078_v52 = vmax.f32 %v3074_v50, 0.0 }
 0x342   : > { %v3079_v53 = vmax.f32 %v3075_v51, 0.0 }
 0x343   : > { %v3082_v54 = vpack.c.bf16 %v3078_v52, %v3078_v52 }
 0x344   : > { %v3083_v44 = vpack.c.bf16 %v3079_v53, %v3079_v53 }
 0x346   : > { %3381 = vmatprep.mubr.bf16.mxu0 %v3083_v44 }
 0x347   : > { %3382 = vmatmul.mubr.bf16.vlgmr.msra.gmra.mrb[20].mxu0 %v3082_v54 }
 0x37a   : > { %v3004_v35 = vpop.f32.mrb[16].mxu0  ;;  %v3045_v48 = vpop.f32.mrb[16].mxu1 }
 0x37b   : > { %v3005_v55 = vadd.f32 %v3004_v35, %v2242_v19  ;;  %v3006_v14 = vpop.f32.mrb[17].mxu0  ;;  %v3047_v34 = vpop.f32.mrb[17].mxu1 }
 0x37c   : > { %v3007_v31 = vadd.f32 %v3006_v14, %v2244_v20  ;;  %v3008_v58 = vpop.f32.mrb[18].mxu0  ;;  %v3049_v60 = vpop.f32.mrb[18].mxu1 }
 0x37d   : > { %v3046_v59 = vadd.f32 %v3045_v48, %v3005_v55  ;;  %v3009_v61 = vpop.f32.mrb[19].mxu0  ;;  %v3050_v1 = vpop.f32.mrb[19].mxu1 }
 0x37e   : > { %v3048_v63 = vadd.f32 %v3047_v34, %v3007_v31 }
 0x37f   : > { %v3076_v2 = vadd.f32 %v3065_v56, %v3046_v59 }
 0x380   : > { %v3077_v3 = vadd.f32 %v3069_v57, %v3048_v63 }
 0x381   : > { %v3080_v4 = vmax.f32 %v3076_v2, 0.0 }
 0x382   : > { %v3081_v5 = vmax.f32 %v3077_v3, 0.0 }
 0x383   : > { %v3084_v7 = vpack.c.bf16 %v3080_v4, %v3080_v4 }
 0x384   : > { %v3085_v6 = vpack.c.bf16 %v3081_v5, %v3081_v5 }
 0x386   : > { %3421 = vmatprep.mubr.bf16.mxu1 %v3085_v6 }
 0x387   : > { %3422 = vmatmul.mubr.bf16.vlgmr.msra.gmra.mrb[20].mxu1 %v3084_v7 }
 0x41a   : > { %v3951_v38 = vpop.f32.mrb[20].mxu0 }
 0x41b   : > { %v3952_v8 = vpop.f32.mrb[21].mxu0 }
 0x41c   : > { %v3953_v9 = vadd.f32 %v3952_v8, %v3951_v38  ;;  %v3954_v10 = vpop.f32.mrb[22].mxu0 }
 0x41d   : > { %v3955_v11 = vpop.f32.mrb[23].mxu0 }
 0x41e   : > { %v3384_v16 = vadd.f32 %v3953_v9, %v3897_v15 }
 0x45a   : > { %v3973_v12 = vpop.f32.mrb[20].mxu1 }
 0x45b   : > { %v3974_v13 = vpop.f32.mrb[21].mxu1 }
 0x45c   : > { %v3975_v17 = vadd.f32 %v3974_v13, %v3973_v12  ;;  %v3976_v18 = vpop.f32.mrb[22].mxu1 }
 0x45d   : > { %v3977_v19 = vpop.f32.mrb[23].mxu1 }
 0x45e   : > { %v3424_v62 = vadd.f32 %v3975_v17, %v3384_v16 }
 0x460   : > { %3430 = vst.msk [vmem:[%s5268_s20] sm:$0xff] %vm3429_vm3, %v3424_v62 }
 0x461 PF: > { %s25_s22 = sadd.s32 1, %s4718_s22   ;;  %s5269_s17 = smov %s4702_s18 }
 0x462   : > { %p22_p4 = scmp.ge.s32.totalorder %s25_s22, 5   ;;  %s5270_s18 = smov %s4706_s19 }
 0x463   : > { %s5271_s19 = smov %s4910_s27  ;;  %s5272_s20 = smov %s4714_s21 }
 0x464   : > { %s5273_s21 = smov %s5275_s11  ;;  %24 = sbr.rel (!%p22_p4) target bundleno = 9 (0x9), region = 126 }
 0x46b   :  { %3450 = vsyncpa [#allocation4], 1 }
 0x46c   :  { %3452 = vsyncpa [#allocation4 + $0x1], 1 }
 0x46d   :  { %3453 = vsyncpa [#allocation6], 1 }

</bundles_post_ra>
